<compile_context>
chip_gen: v7x
topology: tpu7x:2x2x1
jax: 0.10.0
libtpu: 0.0.40
codegen_flags: <defaults>
</compile_context>

<pallas_src>
import jax
import jax.numpy as jnp
import numpy as np
from jax.experimental import pallas as pl
from jax.experimental.pallas import tpu as pltpu


def _round_up(x, m):
    return ((x + m - 1) // m) * m


def _pick_time_chunk(T, max_chunk=16):
    # Largest divisor of T that is <= max_chunk (so the grid tiles T exactly).
    for c in range(min(T, max_chunk), 0, -1):
        if T % c == 0:
            return c
    return 1


def lstm_recurrence_kernel(gx_ref, whh_ref, h_out_ref, h_scr, c_scr):
    """Grid = (batch_blocks, time_chunks); one grid step = Tc LSTM time steps.

    gx_ref    : (Tc, Bblk, 4*Hp)  precomputed x @ W_ih + (b_ih + b_hh), gate-padded
    whh_ref   : (Hp, 4*Hp)        recurrent weights, gate-padded, VMEM-resident
    h_out_ref : (Bblk, Hp)        final hidden state (written on last time chunk)
    h_scr/c_scr : (Bblk, Hp)      carried hidden / cell state across time chunks
    """
    t_chunk = pl.program_id(1)
    Hp = h_scr.shape[-1]
    Tc = gx_ref.shape[0]

    @pl.when(t_chunk == 0)
    def _():
        h_scr[...] = jnp.zeros_like(h_scr)
        c_scr[...] = jnp.zeros_like(c_scr)

    whh = whh_ref[...]  # hoisted out of the time loop

    def step(t, carry):
        h, c = carry
        # Single MXU push per step; input projection + bias already in gx.
        gates = gx_ref[t] + jnp.dot(h, whh, preferred_element_type=jnp.float32)
        # Gate blocks padded to 128-lane multiples -> slices are vreg-aligned.
        # PyTorch gate order: input, forget, cell(g), output.
        i = jax.nn.sigmoid(gates[:, 0 * Hp:1 * Hp])
        f = jax.nn.sigmoid(gates[:, 1 * Hp:2 * Hp])
        g = jnp.tanh(gates[:, 2 * Hp:3 * Hp])
        o = jax.nn.sigmoid(gates[:, 3 * Hp:4 * Hp])
        c = f * c + i * g
        h = o * jnp.tanh(c)
        return h, c

    h, c = jax.lax.fori_loop(0, Tc, step, (h_scr[...], c_scr[...]), unroll=True)
    h_scr[...] = h
    c_scr[...] = c

    @pl.when(t_chunk == pl.num_programs(1) - 1)
    def _():
        h_out_ref[...] = h


def lstm_model_forward(text, params, *, time_chunk=16):
    """text: (T, B) int32. Returns (B, O) float32 logits."""
    emb = params["embed"]       # (V, E), padding row already zeroed
    wih_t = params["wih_t"]     # (E, 4H)
    whh_t = params["whh_t"]     # (H, 4H)
    bias = params["bias"]       # (4H,)  = b_ih + b_hh
    wlin_t = params["wlin_t"]   # (H, O)
    blin = params["blin"]       # (O,)

    T, B = text.shape
    E = emb.shape[1]
    H = whh_t.shape[0]

    Hp = _round_up(H, 128)      # pad each gate block to full lane width
    Bp = _round_up(B, 8)        # sublane-align batch
    if Bp > 128:
        Bp = _round_up(Bp, 128)
        Bblk = 128
    else:
        Bblk = Bp
    nb = Bp // Bblk
    Tc = _pick_time_chunk(T, time_chunk)
    nt = T // Tc

    # Gate-padded weight layouts: gate g occupies columns [g*Hp, g*Hp + H).
    def pad_gates(w):           # (..., 4H) -> (..., 4Hp), zero-padded per gate
        w4 = w.reshape(w.shape[:-1] + (4, H))
        w4 = jnp.pad(w4, [(0, 0)] * (w.ndim - 1) + [(0, 0), (0, Hp - H)])
        return w4.reshape(w.shape[:-1] + (4 * Hp,))

    wih_p = pad_gates(wih_t)                                   # (E, 4Hp)
    whh_p = jnp.pad(pad_gates(whh_t), ((0, Hp - H), (0, 0)))   # (Hp, 4Hp)
    bias_p = pad_gates(bias)                                   # (4Hp,)

    # Glue: embedding lookup + dropout(identity) + batch padding.
    x = jnp.take(emb, text, axis=0)                            # (T, B, E)
    x = jnp.pad(x, ((0, 0), (0, Bp - B), (0, 0)))              # (T, Bp, E)

    # Hoisted input projection: one big matmul instead of T tiny per-step ones.
    gates_x = (x.reshape(T * Bp, E) @ wih_p + bias_p).reshape(T, Bp, 4 * Hp)

    h_final = pl.pallas_call(
        lstm_recurrence_kernel,
        out_shape=jax.ShapeDtypeStruct((Bp, Hp), jnp.float32),
        grid_spec=pltpu.PrefetchScalarGridSpec(
            num_scalar_prefetch=0,
            grid=(nb, nt),
            in_specs=[
                pl.BlockSpec((Tc, Bblk, 4 * Hp), lambda b, t: (t, b, 0)),
                pl.BlockSpec((Hp, 4 * Hp), lambda b, t: (0, 0)),
            ],
            out_specs=pl.BlockSpec((Bblk, Hp), lambda b, t: (b, 0)),
            scratch_shapes=[
                pltpu.VMEM((Bblk, Hp), jnp.float32),   # h
                pltpu.VMEM((Bblk, Hp), jnp.float32),   # c
            ],
        ),
        compiler_params=pltpu.CompilerParams(
            # batch blocks independent -> parallel (v7x megacore); time is serial.
            dimension_semantics=("parallel", "arbitrary"),
        ),
    )(gates_x, whh_p)

    # Final linear done as glue on the real (B, H) hidden: O=2 is too narrow to
    # be a useful MXU shape or lane-dense store inside the kernel.
    h = h_final[:B, :H]
    return h @ wlin_t + blin[None, :]


def reference_forward(text, params):
    """Plain JAX reference of the same forward pass (lax.scan, unpadded, f32)."""
    x = jnp.take(params["embed"], text, axis=0)   # (T, B, E)
    H = params["whh_t"].shape[0]
    B = text.shape[1]

    def step(carry, x_t):
        h, c = carry
        gates = x_t @ params["wih_t"] + h @ params["whh_t"] + params["bias"][None, :]
        i = jax.nn.sigmoid(gates[:, 0 * H:1 * H])
        f = jax.nn.sigmoid(gates[:, 1 * H:2 * H])
        g = jnp.tanh(gates[:, 2 * H:3 * H])
        o = jax.nn.sigmoid(gates[:, 3 * H:4 * H])
        c = f * c + i * g
        h = o * jnp.tanh(c)
        return (h, c), None

    (h, _), _ = jax.lax.scan(step, (jnp.zeros((B, H)), jnp.zeros((B, H))), x)
    return h @ params["wlin_t"] + params["blin"][None, :]


def init_params(key, vocab_size, embedding_size, pad_idx, hidden_size, output_size):
    ks = jax.random.split(key, 7)
    scale = 1.0 / np.sqrt(hidden_size)
    embed = jax.random.normal(ks[0], (vocab_size, embedding_size), jnp.float32)
    embed = embed.at[pad_idx].set(0.0)  # padding_idx row is zero
    w_ih = jax.random.uniform(ks[1], (4 * hidden_size, embedding_size),
                              jnp.float32, -scale, scale)
    w_hh = jax.random.uniform(ks[2], (4 * hidden_size, hidden_size),
                              jnp.float32, -scale, scale)
    b_ih = jax.random.uniform(ks[3], (4 * hidden_size,), jnp.float32, -scale, scale)
    b_hh = jax.random.uniform(ks[4], (4 * hidden_size,), jnp.float32, -scale, scale)
    w_lin = jax.random.uniform(ks[5], (output_size, hidden_size),
                               jnp.float32, -scale, scale)
    b_lin = jax.random.uniform(ks[6], (output_size,), jnp.float32, -scale, scale)
    return {
        "embed": embed,
        "wih_t": w_ih.T,            # (E, 4H)
        "whh_t": w_hh.T,            # (H, 4H)
        "bias": b_ih + b_hh,        # (4H,)
        "wlin_t": w_lin.T,          # (H, O)
        "blin": b_lin,              # (O,)
    }


if __name__ == "__main__":
    # Small, module-consistent shapes.
    VOCAB, EMB, PAD, HIDDEN, OUT = 50, 16, 0, 32, 2
    SEQ, BATCH = 8, 2

    key = jax.random.PRNGKey(0)
    k_param, k_text = jax.random.split(key)
    params = init_params(k_param, VOCAB, EMB, PAD, HIDDEN, OUT)
    text = jax.random.randint(k_text, (SEQ, BATCH), 0, VOCAB, dtype=jnp.int32)

    # TODO(synk): dropout is identity (inference mode); training-time dropout
    # parity is not covered.
    out = jax.block_until_ready(jax.jit(lstm_model_forward)(text, params))
    ref = jax.block_until_ready(reference_forward(text, params))

    assert out.shape == (BATCH, OUT)
    np.testing.assert_allclose(np.asarray(out), np.asarray(ref), atol=1e-2, rtol=1e-2)
    print("KERNEL_OK")
</pallas_src>

<mosaic_0001>
module attributes {stable_mosaic.version = 11 : i64} {
  func.func @lstm_recurrence_kernel(%arg0: i32, %arg1: i32, %arg2: memref<8x8x512xf32, #tpu.memory_space<vmem>>, %arg3: memref<128x512xf32, #tpu.memory_space<vmem>>, %arg4: memref<8x128xf32, #tpu.memory_space<vmem>>, %arg5: memref<8x128xf32, #tpu.memory_space<vmem>>, %arg6: memref<8x128xf32, #tpu.memory_space<vmem>>) attributes {dimension_semantics = [#tpu.dimension_semantics<parallel>, #tpu.dimension_semantics<arbitrary>], iteration_bounds = array<i64: 1, 1>, scalar_prefetch = 0 : i64, scratch_operands = 2 : i64, tpu.core_type = #tpu.core_type<tc>, window_params = [{transform_indices = @transform_0, window_bounds = array<i64: 8, 8, 512>}, {pipeline_mode = #tpu.pipeline_mode<synchronous>, transform_indices = @transform_1, window_bounds = array<i64: 128, 512>}, {transform_indices = @transform_2, window_bounds = array<i64: 8, 128>}]} {
    %c0_i32 = arith.constant 0 : i32
    %0 = arith.cmpi eq, %arg1, %c0_i32 : i32
    %1 = arith.extui %0 : i1 to i32
    %c0_i32_0 = arith.constant 0 : i32
    %2 = arith.cmpi ne, %1, %c0_i32_0 : i32
    scf.if %2 {
      %cst_60 = arith.constant 0.000000e+00 : f32
      %251 = vector.broadcast %cst_60 : f32 to vector<8x128xf32>
      %c0_61 = arith.constant 0 : index
      %c0_62 = arith.constant 0 : index
      %252 = vector.load %arg5[%c0_61, %c0_62] : memref<8x128xf32, #tpu.memory_space<vmem>>, vector<8x128xf32>
      tpu.vector_store %arg5[%c0_61, %c0_62], %251 {strides = array<i32>} : memref<8x128xf32, #tpu.memory_space<vmem>>, vector<8x128xf32>,
      %cst_63 = arith.constant 0.000000e+00 : f32
      %253 = vector.broadcast %cst_63 : f32 to vector<8x128xf32>
      %c0_64 = arith.constant 0 : index
      %c0_65 = arith.constant 0 : index
      %254 = vector.load %arg6[%c0_64, %c0_65] : memref<8x128xf32, #tpu.memory_space<vmem>>, vector<8x128xf32>
      tpu.vector_store %arg6[%c0_64, %c0_65], %253 {strides = array<i32>} : memref<8x128xf32, #tpu.memory_space<vmem>>, vector<8x128xf32>,
    } else {
    }
    %c0 = arith.constant 0 : index
    %c0_1 = arith.constant 0 : index
    %3 = vector.load %arg3[%c0, %c0_1] : memref<128x512xf32, #tpu.memory_space<vmem>>, vector<128x512xf32>
    %c0_2 = arith.constant 0 : index
    %c0_3 = arith.constant 0 : index
    %4 = vector.load %arg5[%c0_2, %c0_3] : memref<8x128xf32, #tpu.memory_space<vmem>>, vector<8x128xf32>
    %c0_4 = arith.constant 0 : index
    %c0_5 = arith.constant 0 : index
    %5 = vector.load %arg6[%c0_4, %c0_5] : memref<8x128xf32, #tpu.memory_space<vmem>>, vector<8x128xf32>
    %c0_i32_6 = arith.constant 0 : i32
    %6 = arith.index_cast %c0_i32_6 : i32 to index
    %c0_7 = arith.constant 0 : index
    %c0_8 = arith.constant 0 : index
    %7 = vector.load %arg2[%6, %c0_7, %c0_8] : memref<8x8x512xf32, #tpu.memory_space<vmem>>, vector<1x8x512xf32>
    %8 = vector.shape_cast %7 : vector<1x8x512xf32> to vector<8x512xf32>
    %cst = arith.constant dense<0.000000e+00> : vector<8x512xf32>
    %9 = tpu.matmul %4, %3, %cst {dimension_numbers = #tpu.dot_dimension_numbers<[1], [0], [0], [1], [0, 0, 1, 1], [], []>} : vector<8x128xf32>, vector<128x512xf32>, vector<8x512xf32> -> vector<8x512xf32>
    %10 = arith.addf %8, %9 : vector<8x512xf32>
    %11 = vector.extract_strided_slice %10 {offsets = [0, 0], sizes = [8, 128], strides = [1, 1]} : vector<8x512xf32> to vector<8x128xf32>
    %12 = arith.negf %11 : vector<8x128xf32>
    %13 = math.exp %12 : vector<8x128xf32>
    %cst_9 = arith.constant 1.000000e+00 : f32
    %14 = vector.broadcast %cst_9 : f32 to vector<8x128xf32>
    %15 = arith.addf %14, %13 : vector<8x128xf32>
    %16 = arith.divf %14, %15 : vector<8x128xf32>
    %17 = vector.extract_strided_slice %10 {offsets = [0, 128], sizes = [8, 128], strides = [1, 1]} : vector<8x512xf32> to vector<8x128xf32>
    %18 = arith.negf %17 : vector<8x128xf32>
    %19 = math.exp %18 : vector<8x128xf32>
    %cst_10 = arith.constant 1.000000e+00 : f32
    %20 = vector.broadcast %cst_10 : f32 to vector<8x128xf32>
    %21 = arith.addf %20, %19 : vector<8x128xf32>
    %22 = arith.divf %20, %21 : vector<8x128xf32>
    %23 = vector.extract_strided_slice %10 {offsets = [0, 256], sizes = [8, 128], strides = [1, 1]} : vector<8x512xf32> to vector<8x128xf32>
    %24 = math.tanh %23 : vector<8x128xf32>
    %25 = vector.extract_strided_slice %10 {offsets = [0, 384], sizes = [8, 128], strides = [1, 1]} : vector<8x512xf32> to vector<8x128xf32>
    %26 = arith.negf %25 : vector<8x128xf32>
    %27 = math.exp %26 : vector<8x128xf32>
    %cst_11 = arith.constant 1.000000e+00 : f32
    %28 = vector.broadcast %cst_11 : f32 to vector<8x128xf32>
    %29 = arith.addf %28, %27 : vector<8x128xf32>
    %30 = arith.divf %28, %29 : vector<8x128xf32>
    %31 = arith.mulf %22, %5 : vector<8x128xf32>
    %32 = arith.mulf %16, %24 : vector<8x128xf32>
    %33 = arith.addf %31, %32 : vector<8x128xf32>
    %34 = math.tanh %33 : vector<8x128xf32>
    %35 = arith.mulf %30, %34 : vector<8x128xf32>
    %c1_i32 = arith.constant 1 : i32
    %36 = arith.index_cast %c1_i32 : i32 to index
    %c0_12 = arith.constant 0 : index
    %c0_13 = arith.constant 0 : index
    %37 = vector.load %arg2[%36, %c0_12, %c0_13] : memref<8x8x512xf32, #tpu.memory_space<vmem>>, vector<1x8x512xf32>
    %38 = vector.shape_cast %37 : vector<1x8x512xf32> to vector<8x512xf32>
    %cst_14 = arith.constant dense<0.000000e+00> : vector<8x512xf32>
    %39 = tpu.matmul %35, %3, %cst_14 {dimension_numbers = #tpu.dot_dimension_numbers<[1], [0], [0], [1], [0, 0, 1, 1], [], []>} : vector<8x128xf32>, vector<128x512xf32>, vector<8x512xf32> -> vector<8x512xf32>
    %40 = arith.addf %38, %39 : vector<8x512xf32>
    %41 = vector.extract_strided_slice %40 {offsets = [0, 0], sizes = [8, 128], strides = [1, 1]} : vector<8x512xf32> to vector<8x128xf32>
    %42 = arith.negf %41 : vector<8x128xf32>
    %43 = math.exp %42 : vector<8x128xf32>
    %cst_15 = arith.constant 1.000000e+00 : f32
    %44 = vector.broadcast %cst_15 : f32 to vector<8x128xf32>
    %45 = arith.addf %44, %43 : vector<8x128xf32>
    %46 = arith.divf %44, %45 : vector<8x128xf32>
    %47 = vector.extract_strided_slice %40 {offsets = [0, 128], sizes = [8, 128], strides = [1, 1]} : vector<8x512xf32> to vector<8x128xf32>
    %48 = arith.negf %47 : vector<8x128xf32>
    %49 = math.exp %48 : vector<8x128xf32>
    %cst_16 = arith.constant 1.000000e+00 : f32
    %50 = vector.broadcast %cst_16 : f32 to vector<8x128xf32>
    %51 = arith.addf %50, %49 : vector<8x128xf32>
    %52 = arith.divf %50, %51 : vector<8x128xf32>
    %53 = vector.extract_strided_slice %40 {offsets = [0, 256], sizes = [8, 128], strides = [1, 1]} : vector<8x512xf32> to vector<8x128xf32>
    %54 = math.tanh %53 : vector<8x128xf32>
    %55 = vector.extract_strided_slice %40 {offsets = [0, 384], sizes = [8, 128], strides = [1, 1]} : vector<8x512xf32> to vector<8x128xf32>
    %56 = arith.negf %55 : vector<8x128xf32>
    %57 = math.exp %56 : vector<8x128xf32>
    %cst_17 = arith.constant 1.000000e+00 : f32
    %58 = vector.broadcast %cst_17 : f32 to vector<8x128xf32>
    %59 = arith.addf %58, %57 : vector<8x128xf32>
    %60 = arith.divf %58, %59 : vector<8x128xf32>
    %61 = arith.mulf %52, %33 : vector<8x128xf32>
    %62 = arith.mulf %46, %54 : vector<8x128xf32>
    %63 = arith.addf %61, %62 : vector<8x128xf32>
    %64 = math.tanh %63 : vector<8x128xf32>
    %65 = arith.mulf %60, %64 : vector<8x128xf32>
    %c2_i32 = arith.constant 2 : i32
    %66 = arith.index_cast %c2_i32 : i32 to index
    %c0_18 = arith.constant 0 : index
    %c0_19 = arith.constant 0 : index
    %67 = vector.load %arg2[%66, %c0_18, %c0_19] : memref<8x8x512xf32, #tpu.memory_space<vmem>>, vector<1x8x512xf32>
    %68 = vector.shape_cast %67 : vector<1x8x512xf32> to vector<8x512xf32>
    %cst_20 = arith.constant dense<0.000000e+00> : vector<8x512xf32>
    %69 = tpu.matmul %65, %3, %cst_20 {dimension_numbers = #tpu.dot_dimension_numbers<[1], [0], [0], [1], [0, 0, 1, 1], [], []>} : vector<8x128xf32>, vector<128x512xf32>, vector<8x512xf32> -> vector<8x512xf32>
    %70 = arith.addf %68, %69 : vector<8x512xf32>
    %71 = vector.extract_strided_slice %70 {offsets = [0, 0], sizes = [8, 128], strides = [1, 1]} : vector<8x512xf32> to vector<8x128xf32>
    %72 = arith.negf %71 : vector<8x128xf32>
    %73 = math.exp %72 : vector<8x128xf32>
    %cst_21 = arith.constant 1.000000e+00 : f32
    %74 = vector.broadcast %cst_21 : f32 to vector<8x128xf32>
    %75 = arith.addf %74, %73 : vector<8x128xf32>
    %76 = arith.divf %74, %75 : vector<8x128xf32>
    %77 = vector.extract_strided_slice %70 {offsets = [0, 128], sizes = [8, 128], strides = [1, 1]} : vector<8x512xf32> to vector<8x128xf32>
    %78 = arith.negf %77 : vector<8x128xf32>
    %79 = math.exp %78 : vector<8x128xf32>
    %cst_22 = arith.constant 1.000000e+00 : f32
    %80 = vector.broadcast %cst_22 : f32 to vector<8x128xf32>
    %81 = arith.addf %80, %79 : vector<8x128xf32>
    %82 = arith.divf %80, %81 : vector<8x128xf32>
    %83 = vector.extract_strided_slice %70 {offsets = [0, 256], sizes = [8, 128], strides = [1, 1]} : vector<8x512xf32> to vector<8x128xf32>
    %84 = math.tanh %83 : vector<8x128xf32>
    %85 = vector.extract_strided_slice %70 {offsets = [0, 384], sizes = [8, 128], strides = [1, 1]} : vector<8x512xf32> to vector<8x128xf32>
    %86 = arith.negf %85 : vector<8x128xf32>
    %87 = math.exp %86 : vector<8x128xf32>
    %cst_23 = arith.constant 1.000000e+00 : f32
    %88 = vector.broadcast %cst_23 : f32 to vector<8x128xf32>
    %89 = arith.addf %88, %87 : vector<8x128xf32>
    %90 = arith.divf %88, %89 : vector<8x128xf32>
    %91 = arith.mulf %82, %63 : vector<8x128xf32>
    %92 = arith.mulf %76, %84 : vector<8x128xf32>
    %93 = arith.addf %91, %92 : vector<8x128xf32>
    %94 = math.tanh %93 : vector<8x128xf32>
    %95 = arith.mulf %90, %94 : vector<8x128xf32>
    %c3_i32 = arith.constant 3 : i32
    %96 = arith.index_cast %c3_i32 : i32 to index
    %c0_24 = arith.constant 0 : index
    %c0_25 = arith.constant 0 : index
    %97 = vector.load %arg2[%96, %c0_24, %c0_25] : memref<8x8x512xf32, #tpu.memory_space<vmem>>, vector<1x8x512xf32>
    %98 = vector.shape_cast %97 : vector<1x8x512xf32> to vector<8x512xf32>
    %cst_26 = arith.constant dense<0.000000e+00> : vector<8x512xf32>
    %99 = tpu.matmul %95, %3, %cst_26 {dimension_numbers = #tpu.dot_dimension_numbers<[1], [0], [0], [1], [0, 0, 1, 1], [], []>} : vector<8x128xf32>, vector<128x512xf32>, vector<8x512xf32> -> vector<8x512xf32>
    %100 = arith.addf %98, %99 : vector<8x512xf32>
    %101 = vector.extract_strided_slice %100 {offsets = [0, 0], sizes = [8, 128], strides = [1, 1]} : vector<8x512xf32> to vector<8x128xf32>
    %102 = arith.negf %101 : vector<8x128xf32>
    %103 = math.exp %102 : vector<8x128xf32>
    %cst_27 = arith.constant 1.000000e+00 : f32
    %104 = vector.broadcast %cst_27 : f32 to vector<8x128xf32>
    %105 = arith.addf %104, %103 : vector<8x128xf32>
    %106 = arith.divf %104, %105 : vector<8x128xf32>
    %107 = vector.extract_strided_slice %100 {offsets = [0, 128], sizes = [8, 128], strides = [1, 1]} : vector<8x512xf32> to vector<8x128xf32>
    %108 = arith.negf %107 : vector<8x128xf32>
    %109 = math.exp %108 : vector<8x128xf32>
    %cst_28 = arith.constant 1.000000e+00 : f32
    %110 = vector.broadcast %cst_28 : f32 to vector<8x128xf32>
    %111 = arith.addf %110, %109 : vector<8x128xf32>
    %112 = arith.divf %110, %111 : vector<8x128xf32>
    %113 = vector.extract_strided_slice %100 {offsets = [0, 256], sizes = [8, 128], strides = [1, 1]} : vector<8x512xf32> to vector<8x128xf32>
    %114 = math.tanh %113 : vector<8x128xf32>
    %115 = vector.extract_strided_slice %100 {offsets = [0, 384], sizes = [8, 128], strides = [1, 1]} : vector<8x512xf32> to vector<8x128xf32>
    %116 = arith.negf %115 : vector<8x128xf32>
    %117 = math.exp %116 : vector<8x128xf32>
    %cst_29 = arith.constant 1.000000e+00 : f32
    %118 = vector.broadcast %cst_29 : f32 to vector<8x128xf32>
    %119 = arith.addf %118, %117 : vector<8x128xf32>
    %120 = arith.divf %118, %119 : vector<8x128xf32>
    %121 = arith.mulf %112, %93 : vector<8x128xf32>
    %122 = arith.mulf %106, %114 : vector<8x128xf32>
    %123 = arith.addf %121, %122 : vector<8x128xf32>
    %124 = math.tanh %123 : vector<8x128xf32>
    %125 = arith.mulf %120, %124 : vector<8x128xf32>
    %c4_i32 = arith.constant 4 : i32
    %126 = arith.index_cast %c4_i32 : i32 to index
    %c0_30 = arith.constant 0 : index
    %c0_31 = arith.constant 0 : index
    %127 = vector.load %arg2[%126, %c0_30, %c0_31] : memref<8x8x512xf32, #tpu.memory_space<vmem>>, vector<1x8x512xf32>
    %128 = vector.shape_cast %127 : vector<1x8x512xf32> to vector<8x512xf32>
    %cst_32 = arith.constant dense<0.000000e+00> : vector<8x512xf32>
    %129 = tpu.matmul %125, %3, %cst_32 {dimension_numbers = #tpu.dot_dimension_numbers<[1], [0], [0], [1], [0, 0, 1, 1], [], []>} : vector<8x128xf32>, vector<128x512xf32>, vector<8x512xf32> -> vector<8x512xf32>
    %130 = arith.addf %128, %129 : vector<8x512xf32>
    %131 = vector.extract_strided_slice %130 {offsets = [0, 0], sizes = [8, 128], strides = [1, 1]} : vector<8x512xf32> to vector<8x128xf32>
    %132 = arith.negf %131 : vector<8x128xf32>
    %133 = math.exp %132 : vector<8x128xf32>
    %cst_33 = arith.constant 1.000000e+00 : f32
    %134 = vector.broadcast %cst_33 : f32 to vector<8x128xf32>
    %135 = arith.addf %134, %133 : vector<8x128xf32>
    %136 = arith.divf %134, %135 : vector<8x128xf32>
    %137 = vector.extract_strided_slice %130 {offsets = [0, 128], sizes = [8, 128], strides = [1, 1]} : vector<8x512xf32> to vector<8x128xf32>
    %138 = arith.negf %137 : vector<8x128xf32>
    %139 = math.exp %138 : vector<8x128xf32>
    %cst_34 = arith.constant 1.000000e+00 : f32
    %140 = vector.broadcast %cst_34 : f32 to vector<8x128xf32>
    %141 = arith.addf %140, %139 : vector<8x128xf32>
    %142 = arith.divf %140, %141 : vector<8x128xf32>
    %143 = vector.extract_strided_slice %130 {offsets = [0, 256], sizes = [8, 128], strides = [1, 1]} : vector<8x512xf32> to vector<8x128xf32>
    %144 = math.tanh %143 : vector<8x128xf32>
    %145 = vector.extract_strided_slice %130 {offsets = [0, 384], sizes = [8, 128], strides = [1, 1]} : vector<8x512xf32> to vector<8x128xf32>
    %146 = arith.negf %145 : vector<8x128xf32>
    %147 = math.exp %146 : vector<8x128xf32>
    %cst_35 = arith.constant 1.000000e+00 : f32
    %148 = vector.broadcast %cst_35 : f32 to vector<8x128xf32>
    %149 = arith.addf %148, %147 : vector<8x128xf32>
    %150 = arith.divf %148, %149 : vector<8x128xf32>
    %151 = arith.mulf %142, %123 : vector<8x128xf32>
    %152 = arith.mulf %136, %144 : vector<8x128xf32>
    %153 = arith.addf %151, %152 : vector<8x128xf32>
    %154 = math.tanh %153 : vector<8x128xf32>
    %155 = arith.mulf %150, %154 : vector<8x128xf32>
    %c5_i32 = arith.constant 5 : i32
    %156 = arith.index_cast %c5_i32 : i32 to index
    %c0_36 = arith.constant 0 : index
    %c0_37 = arith.constant 0 : index
    %157 = vector.load %arg2[%156, %c0_36, %c0_37] : memref<8x8x512xf32, #tpu.memory_space<vmem>>, vector<1x8x512xf32>
    %158 = vector.shape_cast %157 : vector<1x8x512xf32> to vector<8x512xf32>
    %cst_38 = arith.constant dense<0.000000e+00> : vector<8x512xf32>
    %159 = tpu.matmul %155, %3, %cst_38 {dimension_numbers = #tpu.dot_dimension_numbers<[1], [0], [0], [1], [0, 0, 1, 1], [], []>} : vector<8x128xf32>, vector<128x512xf32>, vector<8x512xf32> -> vector<8x512xf32>
    %160 = arith.addf %158, %159 : vector<8x512xf32>
    %161 = vector.extract_strided_slice %160 {offsets = [0, 0], sizes = [8, 128], strides = [1, 1]} : vector<8x512xf32> to vector<8x128xf32>
    %162 = arith.negf %161 : vector<8x128xf32>
    %163 = math.exp %162 : vector<8x128xf32>
    %cst_39 = arith.constant 1.000000e+00 : f32
    %164 = vector.broadcast %cst_39 : f32 to vector<8x128xf32>
    %165 = arith.addf %164, %163 : vector<8x128xf32>
    %166 = arith.divf %164, %165 : vector<8x128xf32>
    %167 = vector.extract_strided_slice %160 {offsets = [0, 128], sizes = [8, 128], strides = [1, 1]} : vector<8x512xf32> to vector<8x128xf32>
    %168 = arith.negf %167 : vector<8x128xf32>
    %169 = math.exp %168 : vector<8x128xf32>
    %cst_40 = arith.constant 1.000000e+00 : f32
    %170 = vector.broadcast %cst_40 : f32 to vector<8x128xf32>
    %171 = arith.addf %170, %169 : vector<8x128xf32>
    %172 = arith.divf %170, %171 : vector<8x128xf32>
    %173 = vector.extract_strided_slice %160 {offsets = [0, 256], sizes = [8, 128], strides = [1, 1]} : vector<8x512xf32> to vector<8x128xf32>
    %174 = math.tanh %173 : vector<8x128xf32>
    %175 = vector.extract_strided_slice %160 {offsets = [0, 384], sizes = [8, 128], strides = [1, 1]} : vector<8x512xf32> to vector<8x128xf32>
    %176 = arith.negf %175 : vector<8x128xf32>
    %177 = math.exp %176 : vector<8x128xf32>
    %cst_41 = arith.constant 1.000000e+00 : f32
    %178 = vector.broadcast %cst_41 : f32 to vector<8x128xf32>
    %179 = arith.addf %178, %177 : vector<8x128xf32>
    %180 = arith.divf %178, %179 : vector<8x128xf32>
    %181 = arith.mulf %172, %153 : vector<8x128xf32>
    %182 = arith.mulf %166, %174 : vector<8x128xf32>
    %183 = arith.addf %181, %182 : vector<8x128xf32>
    %184 = math.tanh %183 : vector<8x128xf32>
    %185 = arith.mulf %180, %184 : vector<8x128xf32>
    %c6_i32 = arith.constant 6 : i32
    %186 = arith.index_cast %c6_i32 : i32 to index
    %c0_42 = arith.constant 0 : index
    %c0_43 = arith.constant 0 : index
    %187 = vector.load %arg2[%186, %c0_42, %c0_43] : memref<8x8x512xf32, #tpu.memory_space<vmem>>, vector<1x8x512xf32>
    %188 = vector.shape_cast %187 : vector<1x8x512xf32> to vector<8x512xf32>
    %cst_44 = arith.constant dense<0.000000e+00> : vector<8x512xf32>
    %189 = tpu.matmul %185, %3, %cst_44 {dimension_numbers = #tpu.dot_dimension_numbers<[1], [0], [0], [1], [0, 0, 1, 1], [], []>} : vector<8x128xf32>, vector<128x512xf32>, vector<8x512xf32> -> vector<8x512xf32>
    %190 = arith.addf %188, %189 : vector<8x512xf32>
    %191 = vector.extract_strided_slice %190 {offsets = [0, 0], sizes = [8, 128], strides = [1, 1]} : vector<8x512xf32> to vector<8x128xf32>
    %192 = arith.negf %191 : vector<8x128xf32>
    %193 = math.exp %192 : vector<8x128xf32>
    %cst_45 = arith.constant 1.000000e+00 : f32
    %194 = vector.broadcast %cst_45 : f32 to vector<8x128xf32>
    %195 = arith.addf %194, %193 : vector<8x128xf32>
    %196 = arith.divf %194, %195 : vector<8x128xf32>
    %197 = vector.extract_strided_slice %190 {offsets = [0, 128], sizes = [8, 128], strides = [1, 1]} : vector<8x512xf32> to vector<8x128xf32>
    %198 = arith.negf %197 : vector<8x128xf32>
    %199 = math.exp %198 : vector<8x128xf32>
    %cst_46 = arith.constant 1.000000e+00 : f32
    %200 = vector.broadcast %cst_46 : f32 to vector<8x128xf32>
    %201 = arith.addf %200, %199 : vector<8x128xf32>
    %202 = arith.divf %200, %201 : vector<8x128xf32>
    %203 = vector.extract_strided_slice %190 {offsets = [0, 256], sizes = [8, 128], strides = [1, 1]} : vector<8x512xf32> to vector<8x128xf32>
    %204 = math.tanh %203 : vector<8x128xf32>
    %205 = vector.extract_strided_slice %190 {offsets = [0, 384], sizes = [8, 128], strides = [1, 1]} : vector<8x512xf32> to vector<8x128xf32>
    %206 = arith.negf %205 : vector<8x128xf32>
    %207 = math.exp %206 : vector<8x128xf32>
    %cst_47 = arith.constant 1.000000e+00 : f32
    %208 = vector.broadcast %cst_47 : f32 to vector<8x128xf32>
    %209 = arith.addf %208, %207 : vector<8x128xf32>
    %210 = arith.divf %208, %209 : vector<8x128xf32>
    %211 = arith.mulf %202, %183 : vector<8x128xf32>
    %212 = arith.mulf %196, %204 : vector<8x128xf32>
    %213 = arith.addf %211, %212 : vector<8x128xf32>
    %214 = math.tanh %213 : vector<8x128xf32>
    %215 = arith.mulf %210, %214 : vector<8x128xf32>
    %c7_i32 = arith.constant 7 : i32
    %216 = arith.index_cast %c7_i32 : i32 to index
    %c0_48 = arith.constant 0 : index
    %c0_49 = arith.constant 0 : index
    %217 = vector.load %arg2[%216, %c0_48, %c0_49] : memref<8x8x512xf32, #tpu.memory_space<vmem>>, vector<1x8x512xf32>
    %218 = vector.shape_cast %217 : vector<1x8x512xf32> to vector<8x512xf32>
    %cst_50 = arith.constant dense<0.000000e+00> : vector<8x512xf32>
    %219 = tpu.matmul %215, %3, %cst_50 {dimension_numbers = #tpu.dot_dimension_numbers<[1], [0], [0], [1], [0, 0, 1, 1], [], []>} : vector<8x128xf32>, vector<128x512xf32>, vector<8x512xf32> -> vector<8x512xf32>
    %220 = arith.addf %218, %219 : vector<8x512xf32>
    %221 = vector.extract_strided_slice %220 {offsets = [0, 0], sizes = [8, 128], strides = [1, 1]} : vector<8x512xf32> to vector<8x128xf32>
    %222 = arith.negf %221 : vector<8x128xf32>
    %223 = math.exp %222 : vector<8x128xf32>
    %cst_51 = arith.constant 1.000000e+00 : f32
    %224 = vector.broadcast %cst_51 : f32 to vector<8x128xf32>
    %225 = arith.addf %224, %223 : vector<8x128xf32>
    %226 = arith.divf %224, %225 : vector<8x128xf32>
    %227 = vector.extract_strided_slice %220 {offsets = [0, 128], sizes = [8, 128], strides = [1, 1]} : vector<8x512xf32> to vector<8x128xf32>
    %228 = arith.negf %227 : vector<8x128xf32>
    %229 = math.exp %228 : vector<8x128xf32>
    %cst_52 = arith.constant 1.000000e+00 : f32
    %230 = vector.broadcast %cst_52 : f32 to vector<8x128xf32>
    %231 = arith.addf %230, %229 : vector<8x128xf32>
    %232 = arith.divf %230, %231 : vector<8x128xf32>
    %233 = vector.extract_strided_slice %220 {offsets = [0, 256], sizes = [8, 128], strides = [1, 1]} : vector<8x512xf32> to vector<8x128xf32>
    %234 = math.tanh %233 : vector<8x128xf32>
    %235 = vector.extract_strided_slice %220 {offsets = [0, 384], sizes = [8, 128], strides = [1, 1]} : vector<8x512xf32> to vector<8x128xf32>
    %236 = arith.negf %235 : vector<8x128xf32>
    %237 = math.exp %236 : vector<8x128xf32>
    %cst_53 = arith.constant 1.000000e+00 : f32
    %238 = vector.broadcast %cst_53 : f32 to vector<8x128xf32>
    %239 = arith.addf %238, %237 : vector<8x128xf32>
    %240 = arith.divf %238, %239 : vector<8x128xf32>
    %241 = arith.mulf %232, %213 : vector<8x128xf32>
    %242 = arith.mulf %226, %234 : vector<8x128xf32>
    %243 = arith.addf %241, %242 : vector<8x128xf32>
    %244 = math.tanh %243 : vector<8x128xf32>
    %245 = arith.mulf %240, %244 : vector<8x128xf32>
    %c8_i32 = arith.constant 8 : i32
    %c0_54 = arith.constant 0 : index
    %c0_55 = arith.constant 0 : index
    %246 = vector.load %arg5[%c0_54, %c0_55] : memref<8x128xf32, #tpu.memory_space<vmem>>, vector<8x128xf32>
    tpu.vector_store %arg5[%c0_54, %c0_55], %245 {strides = array<i32>} : memref<8x128xf32, #tpu.memory_space<vmem>>, vector<8x128xf32>,
    %c0_56 = arith.constant 0 : index
    %c0_57 = arith.constant 0 : index
    %247 = vector.load %arg6[%c0_56, %c0_57] : memref<8x128xf32, #tpu.memory_space<vmem>>, vector<8x128xf32>
    tpu.vector_store %arg6[%c0_56, %c0_57], %243 {strides = array<i32>} : memref<8x128xf32, #tpu.memory_space<vmem>>, vector<8x128xf32>,
    %c0_i32_58 = arith.constant 0 : i32
    %248 = arith.cmpi eq, %arg1, %c0_i32_58 : i32
    %249 = arith.extui %248 : i1 to i32
    %c0_i32_59 = arith.constant 0 : i32
    %250 = arith.cmpi ne, %249, %c0_i32_59 : i32
    scf.if %250 {
      %c0_60 = arith.constant 0 : index
      %c0_61 = arith.constant 0 : index
      %251 = vector.load %arg4[%c0_60, %c0_61] : memref<8x128xf32, #tpu.memory_space<vmem>>, vector<8x128xf32>
      tpu.vector_store %arg4[%c0_60, %c0_61], %245 {strides = array<i32>} : memref<8x128xf32, #tpu.memory_space<vmem>>, vector<8x128xf32>,
    } else {
    }
    return
  }
  func.func @transform_0(%arg0: i32, %arg1: i32) -> (i32, i32, i32) {
    %c0_i32 = arith.constant 0 : i32
    %c0_i32_0 = arith.constant 0 : i32
    return %arg1, %arg0, %c0_i32 : i32, i32, i32
  }
  func.func @transform_1(%arg0: i32, %arg1: i32) -> (i32, i32) {
    %c0_i32 = arith.constant 0 : i32
    %c0_i32_0 = arith.constant 0 : i32
    %c0_i32_1 = arith.constant 0 : i32
    return %c0_i32, %c0_i32_0 : i32, i32
  }
  func.func @transform_2(%arg0: i32, %arg1: i32) -> (i32, i32) {
    %c0_i32 = arith.constant 0 : i32
    %c0_i32_0 = arith.constant 0 : i32
    return %arg0, %c0_i32 : i32, i32
  }
}

</mosaic_0001>

<bundles_post_ra>
// kernel: lstm_model_forward.1
= control target key start
LH: loop header
LB: loop body
LE: loop exit
PB: predicated region body
PF: predicated region fallthrough
CT: control target
= control target key end

     0   :  { %v2185_v3 = vmov 0.0   ;;  %s2854_s1 = inlined_call_operand.vmem [shape: f32[128,512], index: 1, kind: input, shape index: {}]   ;;  %s2855_s0 = inlined_call_operand.vmem [shape: f32[8,8,512], index: 0, kind: input, shape index: {}]   ;;  %s2856_s2 = inlined_call_operand.vmem [shape: f32[8,128], index: 2, kind: output, shape index: {}]  }
   0x1   :  { %v18_v0 = vld [vmem:[%s2854_s1 + $0x8] sm:$0xff]  ;;  %v17_v2 = vld [vmem:[%s2854_s1] sm:$0xff]  ;;  %151 = vmatprep.mubr.f32.mxu0 %v2185_v3  ;;  %222 = vmatprep.mubr.f32.mxu1 %v2185_v3  ;;  %v20_v19 = vld [vmem:[%s2854_s1 + $0x18] sm:$0xff] }
   0x2   :  { %v22_v1 = vld [vmem:[%s2854_s1 + $0x28] sm:$0xff]  ;;  %v21_v5 = vld [vmem:[%s2854_s1 + $0x20] sm:$0xff]  ;;  %v24_v20 = vld [vmem:[%s2854_s1 + $0x38] sm:$0xff] }
   0x3   :  { %v2212_v4 = vpack.c.bf16 %v22_v1, %v18_v0  ;;  %v26_v6 = vld [vmem:[%s2854_s1 + $0x48] sm:$0xff]  ;;  %v2223_v8 = vpack.c.bf16 %v21_v5, %v17_v2  ;;  %v25_v10 = vld [vmem:[%s2854_s1 + $0x40] sm:$0xff]  ;;  %v2264_v22 = vpack.c.bf16 %v24_v20, %v20_v19  ;;  %v19_v23 = vld [vmem:[%s2854_s1 + $0x10] sm:$0xff] }
   0x4   :  { %v30_v7 = vld [vmem:[%s2854_s1 + $0x68] sm:$0xff]  ;;  %v29_v11 = vld [vmem:[%s2854_s1 + $0x60] sm:$0xff]  ;;  %v23_v24 = vld [vmem:[%s2854_s1 + $0x30] sm:$0xff] }
   0x5   :  { %v2225_v9 = vpack.c.bf16 %v30_v7, %v26_v6  ;;  %v34_v12 = vld [vmem:[%s2854_s1 + $0x88] sm:$0xff]  ;;  %1545 = vmatprep.subr.bf16.mxu0 %v2212_v4  ;;  %v2241_v14 = vpack.c.bf16 %v29_v11, %v25_v10  ;;  %v33_v15 = vld [vmem:[%s2854_s1 + $0x80] sm:$0xff]  ;;  %v2272_v25 = vpack.c.bf16 %v23_v24, %v19_v23  ;;  %1577 = vmatprep.subr.bf16.mxu1 %v2264_v22  ;;  %v28_v27 = vld [vmem:[%s2854_s1 + $0x58] sm:$0xff] }
   0x6   :  { %v38_v13 = vld [vmem:[%s2854_s1 + $0xa8] sm:$0xff]  ;;  %1547 = vmatpush1.bf16.msra.mxu0 %v2223_v8  ;;  %v37_v16 = vld [vmem:[%s2854_s1 + $0xa0] sm:$0xff]  ;;  %v32_v28 = vld [vmem:[%s2854_s1 + $0x78] sm:$0xff] }
   0x7   :  { %1549 = vmatprep.subr.bf16.mxu0 %v2225_v9  ;;  %v2250_v17 = vpack.c.bf16 %v38_v13, %v34_v12  ;;  %v42_v18 = vld [vmem:[%s2854_s1 + $0xc8] sm:$0xff]  ;;  %v2275_v26 = vpack.c.bf16 %v37_v16, %v33_v15  ;;  %v27_v29 = vld [vmem:[%s2854_s1 + $0x50] sm:$0xff]  ;;  %v41_v31 = vld [vmem:[%s2854_s1 + $0xc0] sm:$0xff]  ;;  %1579 = vmatpush1.bf16.msra.mxu1 %v2272_v25  ;;  %v2297_v33 = vpack.c.bf16 %v32_v28, %v28_v27 }
   0x8   :  { %v46_v21 = vld [vmem:[%s2854_s1 + $0xe8] sm:$0xff]  ;;  %v45_v32 = vld [vmem:[%s2854_s1 + $0xe0] sm:$0xff]  ;;  %v31_v34 = vld [vmem:[%s2854_s1 + $0x70] sm:$0xff] }
   0x9   :  { %v2288_v30 = vpack.c.bf16 %v46_v21, %v42_v18  ;;  %v50_v35 = vld [vmem:[%s2854_s1 + $0x108] sm:$0xff]  ;;  %v2308_v37 = vpack.c.bf16 %v31_v34, %v27_v29  ;;  %v36_v38 = vld [vmem:[%s2854_s1 + $0x98] sm:$0xff]  ;;  %1581 = vmatprep.subr.bf16.mxu1 %v2297_v33  ;;  %v35_v40 = vld [vmem:[%s2854_s1 + $0x90] sm:$0xff]  ;;  %v2324_v42 = vpack.c.bf16 %v45_v32, %v41_v31 }
   0xa   :  { %1551 = vmatpush1.bf16.msra.mxu0 %v2241_v14  ;;  %v54_v36 = vld [vmem:[%s2854_s1 + $0x128] sm:$0xff]  ;;  %v40_v39 = vld [vmem:[%s2854_s1 + $0xb8] sm:$0xff]  ;;  %v39_v41 = vld [vmem:[%s2854_s1 + $0xb0] sm:$0xff] }
   0xb   :  { %1553 = vmatprep.subr.bf16.mxu0 %v2250_v17  ;;  %v49_v43 = vld [vmem:[%s2854_s1 + $0x100] sm:$0xff]  ;;  %v2332_v45 = vpack.c.bf16 %v40_v39, %v36_v38  ;;  %v2335_v46 = vpack.c.bf16 %v54_v36, %v50_v35  ;;  %1583 = vmatpush1.bf16.msra.mxu1 %v2308_v37  ;;  %v58_v47 = vld [vmem:[%s2854_s1 + $0x148] sm:$0xff]  ;;  %v2341_v48 = vpack.c.bf16 %v39_v41, %v35_v40  ;;  %v44_v49 = vld [vmem:[%s2854_s1 + $0xd8] sm:$0xff] }
   0xc   :  { %v53_v44 = vld [vmem:[%s2854_s1 + $0x120] sm:$0xff]  ;;  %v48_v50 = vld [vmem:[%s2854_s1 + $0xf8] sm:$0xff]  ;;  %v62_v51 = vld [vmem:[%s2854_s1 + $0x168] sm:$0xff] }
   0xd   :  { %1585 = vmatprep.subr.bf16.mxu1 %v2332_v45  ;;  %v2353_v52 = vpack.c.bf16 %v48_v50, %v44_v49  ;;  %v43_v53 = vld [vmem:[%s2854_s1 + $0xd0] sm:$0xff]  ;;  %v2362_v55 = vpack.c.bf16 %v53_v44, %v49_v43  ;;  %v52_v56 = vld [vmem:[%s2854_s1 + $0x118] sm:$0xff]  ;;  %v2371_v58 = vpack.c.bf16 %v62_v51, %v58_v47  ;;  %v57_v59 = vld [vmem:[%s2854_s1 + $0x140] sm:$0xff] }
   0xe   :  { %1555 = vmatpush1.bf16.msra.mxu0 %v2275_v26  ;;  %v47_v54 = vld [vmem:[%s2854_s1 + $0xf0] sm:$0xff]  ;;  %v56_v57 = vld [vmem:[%s2854_s1 + $0x138] sm:$0xff]  ;;  %v61_v60 = vld [vmem:[%s2854_s1 + $0x160] sm:$0xff] }
   0xf   :  { %1557 = vmatprep.subr.bf16.mxu0 %v2288_v30  ;;  %1587 = vmatpush1.bf16.msra.mxu1 %v2341_v48  ;;  %v66_v61 = vld [vmem:[%s2854_s1 + $0x188] sm:$0xff]  ;;  %v2383_v62 = vpack.c.bf16 %v47_v54, %v43_v53  ;;  %v2389_v0 = vpack.c.bf16 %v56_v57, %v52_v56  ;;  %v51_v1 = vld [vmem:[%s2854_s1 + $0x110] sm:$0xff]  ;;  %v60_v5 = vld [vmem:[%s2854_s1 + $0x158] sm:$0xff]  ;;  %v2404_v7 = vpack.c.bf16 %v61_v60, %v57_v59 }
  0x10   :  { %v70_v63 = vld [vmem:[%s2854_s1 + $0x1a8] sm:$0xff]  ;;  %1589 = vmatprep.subr.bf16.mxu1 %v2353_v52  ;;  %v55_v2 = vld [vmem:[%s2854_s1 + $0x130] sm:$0xff]  ;;  %v64_v6 = vld [vmem:[%s2854_s1 + $0x178] sm:$0xff] }
  0x11   :  { %v2407_v10 = vpack.c.bf16 %v70_v63, %v66_v61  ;;  %v65_v11 = vld [vmem:[%s2854_s1 + $0x180] sm:$0xff]  ;;  %v74_v13 = vld [vmem:[%s2854_s1 + $0x1c8] sm:$0xff]  ;;  %v2419_v15 = vpack.c.bf16 %v55_v2, %v51_v1  ;;  %v2425_v18 = vpack.c.bf16 %v64_v6, %v60_v5  ;;  %v59_v19 = vld [vmem:[%s2854_s1 + $0x150] sm:$0xff] }
  0x12   :  { %1559 = vmatpush1.bf16.msra.mxu0 %v2324_v42  ;;  %v69_v12 = vld [vmem:[%s2854_s1 + $0x1a0] sm:$0xff]  ;;  %v78_v16 = vld [vmem:[%s2854_s1 + $0x1e8] sm:$0xff]  ;;  %v63_v20 = vld [vmem:[%s2854_s1 + $0x170] sm:$0xff] }
  0x13   :  { %1561 = vmatprep.subr.bf16.mxu0 %v2335_v46  ;;  %1591 = vmatpush1.bf16.msra.mxu1 %v2383_v62  ;;  %v68_v21 = vld [vmem:[%s2854_s1 + $0x198] sm:$0xff]  ;;  %v2440_v24 = vpack.c.bf16 %v69_v12, %v65_v11  ;;  %v2443_v27 = vpack.c.bf16 %v78_v16, %v74_v13  ;;  %v73_v28 = vld [vmem:[%s2854_s1 + $0x1c0] sm:$0xff]  ;;  %v2452_v31 = vpack.c.bf16 %v63_v20, %v59_v19  ;;  %v67_v34 = vld [vmem:[%s2854_s1 + $0x190] sm:$0xff] }
  0x14   :  { %1593 = vmatprep.subr.bf16.mxu1 %v2389_v0  ;;  %v72_v23 = vld [vmem:[%s2854_s1 + $0x1b8] sm:$0xff]  ;;  %v77_v29 = vld [vmem:[%s2854_s1 + $0x1e0] sm:$0xff]  ;;  %v71_v35 = vld [vmem:[%s2854_s1 + $0x1b0] sm:$0xff] }
  0x15   :  { %v2455_v32 = vpack.c.bf16 %v72_v23, %v68_v21  ;;  %v76_v36 = vld [vmem:[%s2854_s1 + $0x1d8] sm:$0xff]  ;;  %v2470_v39 = vpack.c.bf16 %v77_v29, %v73_v28  ;;  %v2474_v40 = vpack.c.bf16 %v71_v35, %v67_v34  ;;  %v75_v43 = vld [vmem:[%s2854_s1 + $0x1d0] sm:$0xff]  ;;  %v83_v49 = vld [vmem:[%s2855_s0] sm:$0xff] }
  0x16   :  { %1563 = vmatpush1.bf16.msra.mxu0 %v2362_v55  ;;  %v80_v38 = vld [vmem:[%s2854_s1 + $0x1f8] sm:$0xff]  ;;  %v79_v44 = vld [vmem:[%s2854_s1 + $0x1f0] sm:$0xff]  ;;  %v84_v50 = vld [vmem:[%s2855_s0 + $0x8] sm:$0xff] }
  0x17   :  { %1565 = vmatprep.subr.bf16.mxu0 %v2371_v58  ;;  %1595 = vmatpush1.bf16.msra.mxu1 %v2419_v15  ;;  %v2477_v41 = vpack.c.bf16 %v80_v38, %v76_v36  ;;  %v2487_v47 = vpack.c.bf16 %v79_v44, %v75_v43  ;;  %v86_v60 = vld [vmem:[%s2855_s0 + $0x18] sm:$0xff]  ;;  %v85_v2 = vld [vmem:[%s2855_s0 + $0x10] sm:$0xff]  ;;  %v1495_v44 = vld [vmem:[%s2855_s0 + $0x20] sm:$0xff] }
  0x18   :  { %1597 = vmatprep.subr.bf16.mxu1 %v2425_v18 }
  0x1a   :  { %1567 = vmatpush1.bf16.msra.mxu0 %v2404_v7 }
  0x1b   :  { %1569 = vmatprep.subr.bf16.mxu0 %v2407_v10  ;;  %1599 = vmatpush1.bf16.msra.mxu1 %v2452_v31 }
  0x1c   :  { %1601 = vmatprep.subr.bf16.mxu1 %v2455_v32 }
  0x1e   :  { %1571 = vmatpush1.bf16.msra.mxu0 %v2440_v24 }
  0x1f   :  { %1573 = vmatprep.subr.bf16.mxu0 %v2443_v27  ;;  %1603 = vmatpush1.bf16.msra.mxu1 %v2474_v40 }
  0x20   :  { %1605 = vmatprep.subr.bf16.mxu1 %v2477_v41 }
  0x22   :  { %1575 = vmatpush1.bf16.msra.mxu0 %v2470_v39 }
  0x23   :  { %1609 = vmatprep.subr.bf16.mxu0 %v2212_v4  ;;  %1607 = vmatpush1.bf16.msra.mxu1 %v2487_v47 }
  0x24   :  { %1641 = vmatprep.subr.bf16.mxu1 %v2264_v22 }
  0x25   :  { %152 = vmatmul.mubr.f32.vlgmr.msra.gmra.mrb[0].mxu0 %v2185_v3 }
  0x26   :  { %1611 = vmatpush1.bf16.msra.mxu0 %v2223_v8  ;;  %326 = vmatprep.mubr.f32.mxu0 %v2185_v3 }
  0x27   :  { %1613 = vmatprep.subr.bf16.mxu0 %v2225_v9  ;;  %223 = vmatmul.mubr.f32.vlgmr.msra.gmra.mrb[0].mxu1 %v2185_v3 }
  0x28   :  { %1643 = vmatpush1.bf16.msra.mxu1 %v2272_v25  ;;  %397 = vmatprep.mubr.f32.mxu1 %v2185_v3 }
  0x29   :  { %1645 = vmatprep.subr.bf16.mxu1 %v2297_v33 }
  0x2a   :  { %1615 = vmatpush1.bf16.msra.mxu0 %v2241_v14 }
  0x2b   :  { %1617 = vmatprep.subr.bf16.mxu0 %v2250_v17 }
  0x2c   :  { %1647 = vmatpush1.bf16.msra.mxu1 %v2308_v37 }
  0x2d   :  { %1649 = vmatprep.subr.bf16.mxu1 %v2332_v45 }
  0x2e   :  { %1619 = vmatpush1.bf16.msra.mxu0 %v2275_v26 }
  0x2f   :  { %1621 = vmatprep.subr.bf16.mxu0 %v2288_v30 }
  0x30   :  { %1651 = vmatpush1.bf16.msra.mxu1 %v2341_v48 }
  0x31   :  { %1653 = vmatprep.subr.bf16.mxu1 %v2353_v52 }
  0x32   :  { %1623 = vmatpush1.bf16.msra.mxu0 %v2324_v42 }
  0x33   :  { %1625 = vmatprep.subr.bf16.mxu0 %v2335_v46 }
  0x34   :  { %1655 = vmatpush1.bf16.msra.mxu1 %v2383_v62 }
  0x35   :  { %1657 = vmatprep.subr.bf16.mxu1 %v2389_v0 }
  0x36   :  { %1627 = vmatpush1.bf16.msra.mxu0 %v2362_v55 }
  0x37   :  { %1629 = vmatprep.subr.bf16.mxu0 %v2371_v58 }
  0x38   :  { %1659 = vmatpush1.bf16.msra.mxu1 %v2419_v15 }
  0x39   :  { %1661 = vmatprep.subr.bf16.mxu1 %v2425_v18 }
  0x3a   :  { %1631 = vmatpush1.bf16.msra.mxu0 %v2404_v7 }
  0x3b   :  { %1633 = vmatprep.subr.bf16.mxu0 %v2407_v10 }
  0x3c   :  { %1663 = vmatpush1.bf16.msra.mxu1 %v2452_v31 }
  0x3d   :  { %1665 = vmatprep.subr.bf16.mxu1 %v2455_v32 }
  0x3e   :  { %1635 = vmatpush1.bf16.msra.mxu0 %v2440_v24 }
  0x3f   :  { %1637 = vmatprep.subr.bf16.mxu0 %v2443_v27 }
  0x40   :  { %1667 = vmatpush1.bf16.msra.mxu1 %v2474_v40 }
  0x41   :  { %1669 = vmatprep.subr.bf16.mxu1 %v2477_v41 }
  0x42   :  { %1639 = vmatpush1.bf16.msra.mxu0 %v2470_v39 }
  0x43   :  { %1673 = vmatprep.subr.bf16.mxu0 %v2212_v4 }
  0x44   :  { %1671 = vmatpush1.bf16.msra.mxu1 %v2487_v47 }
  0x45   :  { %1705 = vmatprep.subr.bf16.mxu1 %v2264_v22 }
  0xf8   :  { %v153_v51 = vpop.f32.mrb[0].mxu0 }
  0xf9   :  { %v229_v53 = vadd.f32 %v153_v51, %v83_v49  ;;  %v155_v54 = vpop.f32.mrb[1].mxu0  ;;  %v1496_v49 = vld [vmem:[%s2855_s0 + $0x28] sm:$0xff] }
  0xfa   :  { %v230_v56 = vadd.f32 %v155_v54, %v84_v50  ;;  %v224_v61 = vpop.f32.mrb[0].mxu1 }
  0xfb   :  { %v1492_v57 = vmul.f32 -1.442695, %v229_v53  ;;  %v226_v63 = vpop.f32.mrb[1].mxu1  ;;  %v231_v6 = vadd.f32 %v224_v61, %v85_v2  ;;  %v1498_v61 = vld [vmem:[%s2855_s0 + $0x38] sm:$0xff] }
  0xfc   :  { %v1493_v59 = vmul.f32 -1.442695, %v230_v56  ;;  %v232_v1 = vadd.f32 %v226_v63, %v86_v60 }
  0xfd   :  { %2057 = vpow2.f32 %v1492_v57 }
  0xfe   :  { %2059 = vpow2.f32 %v1493_v59  ;;  %v1494_v5 = vmul.f32 -1.442695, %v232_v1  ;;  %v1497_v1 = vld [vmem:[%s2855_s0 + $0x30] sm:$0xff] }
 0x100   :  { %2061 = vpow2.f32 %v1494_v5 }
 0x101   :  { %2063 = vtanh.f32 %v231_v6 }
 0x107   :  { %v2058_v11 = vpop.eup %2057 }
 0x108   :  { %v2060_v12 = vpop.eup %2059  ;;  %v236_v13 = vadd.f32 1.0, %v2058_v11 }
 0x109   :  { %v242_v16 = vadd.f32 1.0, %v2060_v12 }
 0x10a   :  { %2065 = vrcp.f32 %v236_v13  ;;  %v2062_v19 = vpop.eup %2061 }
 0x10b   :  { %2067 = vrcp.f32 %v242_v16  ;;  %v2064_v20 = vpop.eup %2063  ;;  %v249_v23 = vadd.f32 1.0, %v2062_v19 }
 0x10d   :  { %2069 = vrcp.f32 %v249_v23 }
 0x114   :  { %v2066_v21 = vpop.eup %2065 }
 0x115   :  { %v2068_v28 = vpop.eup %2067  ;;  %v253_v29 = vmul.f32 %v2066_v21, %v2064_v20 }
 0x116   :  { %v252_v34 = vmul.f32 0.0, %v2068_v28 }
 0x117   :  { %v2070_v36 = vpop.eup %2069 }
 0x118   :  { %v2541_v35 = vadd.f32 %v253_v29, %v252_v34 }
 0x11a   :  { %2071 = vtanh.f32 %v2541_v35 }
 0x124   :  { %v2072_v38 = vpop.eup %2071 }
 0x125   :  { %v256_v43 = vmul.f32 %v2072_v38, %v2070_v36 }
 0x127   :  { %327 = vmatmul.mubr.f32.vlgmr.msra.gmra.mrb[2].mxu0 %v256_v43  ;;  %398 = vmatmul.mubr.f32.vlgmr.msra.gmra.mrb[2].mxu1 %v256_v43 }
 0x128   :  { %1675 = vmatpush1.bf16.msra.mxu0 %v2223_v8  ;;  %1707 = vmatpush1.bf16.msra.mxu1 %v2272_v25 }
 0x129   :  { %1677 = vmatprep.subr.bf16.mxu0 %v2225_v9  ;;  %1709 = vmatprep.subr.bf16.mxu1 %v2297_v33 }
 0x12a   :  { %501 = vmatprep.mubr.f32.mxu0 %v2185_v3  ;;  %572 = vmatprep.mubr.f32.mxu1 %v2185_v3 }
 0x12c   :  { %1679 = vmatpush1.bf16.msra.mxu0 %v2241_v14  ;;  %1711 = vmatpush1.bf16.msra.mxu1 %v2308_v37 }
 0x12d   :  { %1681 = vmatprep.subr.bf16.mxu0 %v2250_v17  ;;  %1713 = vmatprep.subr.bf16.mxu1 %v2332_v45 }
 0x130   :  { %1683 = vmatpush1.bf16.msra.mxu0 %v2275_v26  ;;  %1715 = vmatpush1.bf16.msra.mxu1 %v2341_v48 }
 0x131   :  { %1685 = vmatprep.subr.bf16.mxu0 %v2288_v30  ;;  %1717 = vmatprep.subr.bf16.mxu1 %v2353_v52 }
 0x134   :  { %1687 = vmatpush1.bf16.msra.mxu0 %v2324_v42  ;;  %1719 = vmatpush1.bf16.msra.mxu1 %v2383_v62 }
 0x135   :  { %1689 = vmatprep.subr.bf16.mxu0 %v2335_v46  ;;  %1721 = vmatprep.subr.bf16.mxu1 %v2389_v0 }
 0x138   :  { %1691 = vmatpush1.bf16.msra.mxu0 %v2362_v55  ;;  %1723 = vmatpush1.bf16.msra.mxu1 %v2419_v15 }
 0x139   :  { %1693 = vmatprep.subr.bf16.mxu0 %v2371_v58  ;;  %1725 = vmatprep.subr.bf16.mxu1 %v2425_v18 }
 0x13c   :  { %1695 = vmatpush1.bf16.msra.mxu0 %v2404_v7  ;;  %1727 = vmatpush1.bf16.msra.mxu1 %v2452_v31 }
 0x13d   :  { %1697 = vmatprep.subr.bf16.mxu0 %v2407_v10  ;;  %1729 = vmatprep.subr.bf16.mxu1 %v2455_v32 }
 0x140   :  { %1699 = vmatpush1.bf16.msra.mxu0 %v2440_v24  ;;  %1731 = vmatpush1.bf16.msra.mxu1 %v2474_v40 }
 0x141   :  { %1701 = vmatprep.subr.bf16.mxu0 %v2443_v27  ;;  %1733 = vmatprep.subr.bf16.mxu1 %v2477_v41 }
 0x144   :  { %1703 = vmatpush1.bf16.msra.mxu0 %v2470_v39  ;;  %1735 = vmatpush1.bf16.msra.mxu1 %v2487_v47 }
 0x145   :  { %1737 = vmatprep.subr.bf16.mxu0 %v2212_v4  ;;  %1769 = vmatprep.subr.bf16.mxu1 %v2264_v22 }
 0x1fa   :  { %v328_v50 = vpop.f32.mrb[2].mxu0  ;;  %v399_v51 = vpop.f32.mrb[2].mxu1 }
 0x1fb   :  { %v404_v53 = vadd.f32 %v1495_v44, %v328_v50  ;;  %v330_v54 = vpop.f32.mrb[3].mxu0  ;;  %v401_v56 = vpop.f32.mrb[3].mxu1  ;;  %v406_v5 = vadd.f32 %v1497_v1, %v399_v51  ;;  %v1503_v44 = vld [vmem:[%s2855_s0 + $0x48] sm:$0xff] }
 0x1fc   :  { %v405_v57 = vadd.f32 %v1496_v49, %v330_v54  ;;  %v407_v63 = vadd.f32 %v1498_v61, %v401_v56 }
 0x1fd   :  { %v1499_v59 = vmul.f32 -1.442695, %v404_v53 }
 0x1fe   :  { %v1500_v60 = vmul.f32 -1.442695, %v405_v57  ;;  %v1501_v2 = vmul.f32 -1.442695, %v407_v63  ;;  %v1504_v63 = vld [vmem:[%s2855_s0 + $0x50] sm:$0xff] }
 0x1ff   :  { %2073 = vpow2.f32 %v1499_v59 }
 0x200   :  { %2075 = vpow2.f32 %v1500_v60  ;;  %v1505_v60 = vld [vmem:[%s2855_s0 + $0x58] sm:$0xff] }
 0x201   :  { %2077 = vpow2.f32 %v1501_v2 }
 0x202   :  { %2079 = vtanh.f32 %v406_v5 }
 0x209   :  { %v2074_v6 = vpop.eup %2073 }
 0x20a   :  { %v2076_v11 = vpop.eup %2075  ;;  %v411_v12 = vadd.f32 1.0, %v2074_v6 }
 0x20b   :  { %v417_v13 = vadd.f32 1.0, %v2076_v11  ;;  %v2078_v16 = vpop.eup %2077 }
 0x20c   :  { %2081 = vrcp.f32 %v411_v12  ;;  %v2080_v19 = vpop.eup %2079  ;;  %v424_v28 = vadd.f32 1.0, %v2078_v16 }
 0x20d   :  { %2083 = vrcp.f32 %v417_v13 }
 0x20e   :  { %2085 = vrcp.f32 %v424_v28 }
 0x216   :  { %v2082_v20 = vpop.eup %2081 }
 0x217   :  { %v2084_v21 = vpop.eup %2083  ;;  %v428_v23 = vmul.f32 %v2082_v20, %v2080_v19 }
 0x218   :  { %v427_v29 = vmul.f32 %v2084_v21, %v2541_v35  ;;  %v2086_v36 = vpop.eup %2085  ;;  %v1502_v35 = vld [vmem:[%s2855_s0 + $0x40] sm:$0xff] }
 0x21a   :  { %v2591_v34 = vadd.f32 %v428_v23, %v427_v29 }
 0x21c   :  { %2087 = vtanh.f32 %v2591_v34 }
 0x226   :  { %v2088_v38 = vpop.eup %2087 }
 0x227   :  { %v431_v43 = vmul.f32 %v2088_v38, %v2086_v36 }
 0x229   :  { %502 = vmatmul.mubr.f32.vlgmr.msra.gmra.mrb[4].mxu0 %v431_v43  ;;  %573 = vmatmul.mubr.f32.vlgmr.msra.gmra.mrb[4].mxu1 %v431_v43 }
 0x22a   :  { %1739 = vmatpush1.bf16.msra.mxu0 %v2223_v8  ;;  %1771 = vmatpush1.bf16.msra.mxu1 %v2272_v25 }
 0x22b   :  { %1741 = vmatprep.subr.bf16.mxu0 %v2225_v9  ;;  %1773 = vmatprep.subr.bf16.mxu1 %v2297_v33 }
 0x22c   :  { %676 = vmatprep.mubr.f32.mxu0 %v2185_v3  ;;  %747 = vmatprep.mubr.f32.mxu1 %v2185_v3 }
 0x22e   :  { %1743 = vmatpush1.bf16.msra.mxu0 %v2241_v14  ;;  %1775 = vmatpush1.bf16.msra.mxu1 %v2308_v37 }
 0x22f   :  { %1745 = vmatprep.subr.bf16.mxu0 %v2250_v17  ;;  %1777 = vmatprep.subr.bf16.mxu1 %v2332_v45 }
 0x232   :  { %1747 = vmatpush1.bf16.msra.mxu0 %v2275_v26  ;;  %1779 = vmatpush1.bf16.msra.mxu1 %v2341_v48 }
 0x233   :  { %1749 = vmatprep.subr.bf16.mxu0 %v2288_v30  ;;  %1781 = vmatprep.subr.bf16.mxu1 %v2353_v52 }
 0x236   :  { %1751 = vmatpush1.bf16.msra.mxu0 %v2324_v42  ;;  %1783 = vmatpush1.bf16.msra.mxu1 %v2383_v62 }
 0x237   :  { %1753 = vmatprep.subr.bf16.mxu0 %v2335_v46  ;;  %1785 = vmatprep.subr.bf16.mxu1 %v2389_v0 }
 0x23a   :  { %1755 = vmatpush1.bf16.msra.mxu0 %v2362_v55  ;;  %1787 = vmatpush1.bf16.msra.mxu1 %v2419_v15 }
 0x23b   :  { %1757 = vmatprep.subr.bf16.mxu0 %v2371_v58  ;;  %1789 = vmatprep.subr.bf16.mxu1 %v2425_v18 }
 0x23e   :  { %1759 = vmatpush1.bf16.msra.mxu0 %v2404_v7  ;;  %1791 = vmatpush1.bf16.msra.mxu1 %v2452_v31 }
 0x23f   :  { %1761 = vmatprep.subr.bf16.mxu0 %v2407_v10  ;;  %1793 = vmatprep.subr.bf16.mxu1 %v2455_v32 }
 0x242   :  { %1763 = vmatpush1.bf16.msra.mxu0 %v2440_v24  ;;  %1795 = vmatpush1.bf16.msra.mxu1 %v2474_v40 }
 0x243   :  { %1765 = vmatprep.subr.bf16.mxu0 %v2443_v27  ;;  %1797 = vmatprep.subr.bf16.mxu1 %v2477_v41 }
 0x246   :  { %1767 = vmatpush1.bf16.msra.mxu0 %v2470_v39  ;;  %1799 = vmatpush1.bf16.msra.mxu1 %v2487_v47 }
 0x247   :  { %1801 = vmatprep.subr.bf16.mxu0 %v2212_v4  ;;  %1833 = vmatprep.subr.bf16.mxu1 %v2264_v22 }
 0x2fc   :  { %v503_v49 = vpop.f32.mrb[4].mxu0  ;;  %v574_v50 = vpop.f32.mrb[4].mxu1 }
 0x2fd   :  { %v579_v51 = vadd.f32 %v1502_v35, %v503_v49  ;;  %v505_v53 = vpop.f32.mrb[5].mxu0  ;;  %v576_v54 = vpop.f32.mrb[5].mxu1  ;;  %v581_v2 = vadd.f32 %v1504_v63, %v574_v50  ;;  %v1510_v35 = vld [vmem:[%s2855_s0 + $0x68] sm:$0xff] }
 0x2fe   :  { %v580_v56 = vadd.f32 %v1503_v44, %v505_v53  ;;  %v582_v61 = vadd.f32 %v1505_v60, %v576_v54 }
 0x2ff   :  { %v1506_v57 = vmul.f32 -1.442695, %v579_v51 }
 0x300   :  { %v1507_v59 = vmul.f32 -1.442695, %v580_v56  ;;  %v1508_v1 = vmul.f32 -1.442695, %v582_v61  ;;  %v1511_v61 = vld [vmem:[%s2855_s0 + $0x70] sm:$0xff] }
 0x301   :  { %2089 = vpow2.f32 %v1506_v57 }
 0x302   :  { %2091 = vpow2.f32 %v1507_v59  ;;  %v1512_v59 = vld [vmem:[%s2855_s0 + $0x78] sm:$0xff] }
 0x303   :  { %2093 = vpow2.f32 %v1508_v1 }
 0x304   :  { %2095 = vtanh.f32 %v581_v2 }
 0x30b   :  { %v2090_v5 = vpop.eup %2089 }
 0x30c   :  { %v2092_v6 = vpop.eup %2091  ;;  %v586_v11 = vadd.f32 1.0, %v2090_v5 }
 0x30d   :  { %v592_v12 = vadd.f32 1.0, %v2092_v6  ;;  %v2094_v13 = vpop.eup %2093 }
 0x30e   :  { %2097 = vrcp.f32 %v586_v11  ;;  %v2096_v16 = vpop.eup %2095  ;;  %v599_v23 = vadd.f32 1.0, %v2094_v13 }
 0x30f   :  { %2099 = vrcp.f32 %v592_v12 }
 0x310   :  { %2101 = vrcp.f32 %v599_v23 }
 0x318   :  { %v2098_v19 = vpop.eup %2097 }
 0x319   :  { %v2100_v20 = vpop.eup %2099  ;;  %v603_v21 = vmul.f32 %v2098_v19, %v2096_v16 }
 0x31a   :  { %v602_v28 = vmul.f32 %v2100_v20, %v2591_v34  ;;  %v2102_v36 = vpop.eup %2101  ;;  %v1509_v34 = vld [vmem:[%s2855_s0 + $0x60] sm:$0xff] }
 0x31c   :  { %v2641_v29 = vadd.f32 %v603_v21, %v602_v28 }
 0x31e   :  { %2103 = vtanh.f32 %v2641_v29 }
 0x328   :  { %v2104_v38 = vpop.eup %2103 }
 0x329   :  { %v606_v43 = vmul.f32 %v2104_v38, %v2102_v36 }
 0x32b   :  { %677 = vmatmul.mubr.f32.vlgmr.msra.gmra.mrb[6].mxu0 %v606_v43  ;;  %748 = vmatmul.mubr.f32.vlgmr.msra.gmra.mrb[6].mxu1 %v606_v43 }
 0x32c   :  { %1803 = vmatpush1.bf16.msra.mxu0 %v2223_v8  ;;  %1835 = vmatpush1.bf16.msra.mxu1 %v2272_v25 }
 0x32d   :  { %1805 = vmatprep.subr.bf16.mxu0 %v2225_v9  ;;  %1837 = vmatprep.subr.bf16.mxu1 %v2297_v33 }
 0x32e   :  { %851 = vmatprep.mubr.f32.mxu0 %v2185_v3  ;;  %922 = vmatprep.mubr.f32.mxu1 %v2185_v3 }
 0x330   :  { %1807 = vmatpush1.bf16.msra.mxu0 %v2241_v14  ;;  %1839 = vmatpush1.bf16.msra.mxu1 %v2308_v37 }
 0x331   :  { %1809 = vmatprep.subr.bf16.mxu0 %v2250_v17  ;;  %1841 = vmatprep.subr.bf16.mxu1 %v2332_v45 }
 0x334   :  { %1811 = vmatpush1.bf16.msra.mxu0 %v2275_v26  ;;  %1843 = vmatpush1.bf16.msra.mxu1 %v2341_v48 }
 0x335   :  { %1813 = vmatprep.subr.bf16.mxu0 %v2288_v30  ;;  %1845 = vmatprep.subr.bf16.mxu1 %v2353_v52 }
 0x338   :  { %1815 = vmatpush1.bf16.msra.mxu0 %v2324_v42  ;;  %1847 = vmatpush1.bf16.msra.mxu1 %v2383_v62 }
 0x339   :  { %1817 = vmatprep.subr.bf16.mxu0 %v2335_v46  ;;  %1849 = vmatprep.subr.bf16.mxu1 %v2389_v0 }
 0x33c   :  { %1819 = vmatpush1.bf16.msra.mxu0 %v2362_v55  ;;  %1851 = vmatpush1.bf16.msra.mxu1 %v2419_v15 }
 0x33d   :  { %1821 = vmatprep.subr.bf16.mxu0 %v2371_v58  ;;  %1853 = vmatprep.subr.bf16.mxu1 %v2425_v18 }
 0x340   :  { %1823 = vmatpush1.bf16.msra.mxu0 %v2404_v7  ;;  %1855 = vmatpush1.bf16.msra.mxu1 %v2452_v31 }
 0x341   :  { %1825 = vmatprep.subr.bf16.mxu0 %v2407_v10  ;;  %1857 = vmatprep.subr.bf16.mxu1 %v2455_v32 }
 0x344   :  { %1827 = vmatpush1.bf16.msra.mxu0 %v2440_v24  ;;  %1859 = vmatpush1.bf16.msra.mxu1 %v2474_v40 }
 0x345   :  { %1829 = vmatprep.subr.bf16.mxu0 %v2443_v27  ;;  %1861 = vmatprep.subr.bf16.mxu1 %v2477_v41 }
 0x348   :  { %1831 = vmatpush1.bf16.msra.mxu0 %v2470_v39  ;;  %1863 = vmatpush1.bf16.msra.mxu1 %v2487_v47 }
 0x349   :  { %1865 = vmatprep.subr.bf16.mxu0 %v2212_v4  ;;  %1897 = vmatprep.subr.bf16.mxu1 %v2264_v22 }
 0x3fe   :  { %v678_v44 = vpop.f32.mrb[6].mxu0  ;;  %v749_v49 = vpop.f32.mrb[6].mxu1 }
 0x3ff   :  { %v754_v50 = vadd.f32 %v1509_v34, %v678_v44  ;;  %v680_v51 = vpop.f32.mrb[7].mxu0  ;;  %v751_v53 = vpop.f32.mrb[7].mxu1  ;;  %v756_v1 = vadd.f32 %v1511_v61, %v749_v49  ;;  %v1517_v34 = vld [vmem:[%s2855_s0 + $0x88] sm:$0xff] }
 0x400   :  { %v755_v54 = vadd.f32 %v1510_v35, %v680_v51  ;;  %v757_v60 = vadd.f32 %v1512_v59, %v751_v53 }
 0x401   :  { %v1513_v56 = vmul.f32 -1.442695, %v754_v50 }
 0x402   :  { %v1514_v57 = vmul.f32 -1.442695, %v755_v54  ;;  %v1515_v63 = vmul.f32 -1.442695, %v757_v60  ;;  %v1518_v60 = vld [vmem:[%s2855_s0 + $0x90] sm:$0xff] }
 0x403   :  { %2105 = vpow2.f32 %v1513_v56 }
 0x404   :  { %2107 = vpow2.f32 %v1514_v57  ;;  %v1519_v57 = vld [vmem:[%s2855_s0 + $0x98] sm:$0xff] }
 0x405   :  { %2109 = vpow2.f32 %v1515_v63 }
 0x406   :  { %2111 = vtanh.f32 %v756_v1 }
 0x40d   :  { %v2106_v2 = vpop.eup %2105 }
 0x40e   :  { %v2108_v5 = vpop.eup %2107  ;;  %v761_v6 = vadd.f32 1.0, %v2106_v2 }
 0x40f   :  { %v767_v11 = vadd.f32 1.0, %v2108_v5  ;;  %v2110_v12 = vpop.eup %2109 }
 0x410   :  { %2113 = vrcp.f32 %v761_v6  ;;  %v2112_v13 = vpop.eup %2111  ;;  %v774_v21 = vadd.f32 1.0, %v2110_v12 }
 0x411   :  { %2115 = vrcp.f32 %v767_v11 }
 0x412   :  { %2117 = vrcp.f32 %v774_v21 }
 0x41a   :  { %v2114_v16 = vpop.eup %2113 }
 0x41b   :  { %v2116_v19 = vpop.eup %2115  ;;  %v778_v20 = vmul.f32 %v2114_v16, %v2112_v13 }
 0x41c   :  { %v777_v23 = vmul.f32 %v2116_v19, %v2641_v29  ;;  %v2118_v36 = vpop.eup %2117  ;;  %v1516_v29 = vld [vmem:[%s2855_s0 + $0x80] sm:$0xff] }
 0x41e   :  { %v2691_v28 = vadd.f32 %v778_v20, %v777_v23 }
 0x420   :  { %2119 = vtanh.f32 %v2691_v28 }
 0x42a   :  { %v2120_v38 = vpop.eup %2119 }
 0x42b   :  { %v781_v43 = vmul.f32 %v2120_v38, %v2118_v36 }
 0x42d   :  { %852 = vmatmul.mubr.f32.vlgmr.msra.gmra.mrb[8].mxu0 %v781_v43  ;;  %923 = vmatmul.mubr.f32.vlgmr.msra.gmra.mrb[8].mxu1 %v781_v43 }
 0x42e   :  { %1867 = vmatpush1.bf16.msra.mxu0 %v2223_v8  ;;  %1899 = vmatpush1.bf16.msra.mxu1 %v2272_v25 }
 0x42f   :  { %1869 = vmatprep.subr.bf16.mxu0 %v2225_v9  ;;  %1901 = vmatprep.subr.bf16.mxu1 %v2297_v33 }
 0x430   :  { %1026 = vmatprep.mubr.f32.mxu0 %v2185_v3  ;;  %1097 = vmatprep.mubr.f32.mxu1 %v2185_v3 }
 0x432   :  { %1871 = vmatpush1.bf16.msra.mxu0 %v2241_v14  ;;  %1903 = vmatpush1.bf16.msra.mxu1 %v2308_v37 }
 0x433   :  { %1873 = vmatprep.subr.bf16.mxu0 %v2250_v17  ;;  %1905 = vmatprep.subr.bf16.mxu1 %v2332_v45 }
 0x436   :  { %1875 = vmatpush1.bf16.msra.mxu0 %v2275_v26  ;;  %1907 = vmatpush1.bf16.msra.mxu1 %v2341_v48 }
 0x437   :  { %1877 = vmatprep.subr.bf16.mxu0 %v2288_v30  ;;  %1909 = vmatprep.subr.bf16.mxu1 %v2353_v52 }
 0x43a   :  { %1879 = vmatpush1.bf16.msra.mxu0 %v2324_v42  ;;  %1911 = vmatpush1.bf16.msra.mxu1 %v2383_v62 }
 0x43b   :  { %1881 = vmatprep.subr.bf16.mxu0 %v2335_v46  ;;  %1913 = vmatprep.subr.bf16.mxu1 %v2389_v0 }
 0x43e   :  { %1883 = vmatpush1.bf16.msra.mxu0 %v2362_v55  ;;  %1915 = vmatpush1.bf16.msra.mxu1 %v2419_v15 }
 0x43f   :  { %1885 = vmatprep.subr.bf16.mxu0 %v2371_v58  ;;  %1917 = vmatprep.subr.bf16.mxu1 %v2425_v18 }
 0x442   :  { %1887 = vmatpush1.bf16.msra.mxu0 %v2404_v7  ;;  %1919 = vmatpush1.bf16.msra.mxu1 %v2452_v31 }
 0x443   :  { %1889 = vmatprep.subr.bf16.mxu0 %v2407_v10  ;;  %1921 = vmatprep.subr.bf16.mxu1 %v2455_v32 }
 0x446   :  { %1891 = vmatpush1.bf16.msra.mxu0 %v2440_v24  ;;  %1923 = vmatpush1.bf16.msra.mxu1 %v2474_v40 }
 0x447   :  { %1893 = vmatprep.subr.bf16.mxu0 %v2443_v27  ;;  %1925 = vmatprep.subr.bf16.mxu1 %v2477_v41 }
 0x44a   :  { %1895 = vmatpush1.bf16.msra.mxu0 %v2470_v39  ;;  %1927 = vmatpush1.bf16.msra.mxu1 %v2487_v47 }
 0x44b   :  { %1929 = vmatprep.subr.bf16.mxu0 %v2212_v4  ;;  %1961 = vmatprep.subr.bf16.mxu1 %v2264_v22 }
 0x500   :  { %v853_v35 = vpop.f32.mrb[8].mxu0  ;;  %v924_v44 = vpop.f32.mrb[8].mxu1 }
 0x501   :  { %v929_v49 = vadd.f32 %v1516_v29, %v853_v35  ;;  %v855_v50 = vpop.f32.mrb[9].mxu0  ;;  %v926_v51 = vpop.f32.mrb[9].mxu1  ;;  %v931_v63 = vadd.f32 %v1518_v60, %v924_v44  ;;  %v1524_v29 = vld [vmem:[%s2855_s0 + $0xa8] sm:$0xff] }
 0x502   :  { %v930_v53 = vadd.f32 %v1517_v34, %v855_v50  ;;  %v932_v59 = vadd.f32 %v1519_v57, %v926_v51 }
 0x503   :  { %v1520_v54 = vmul.f32 -1.442695, %v929_v49 }
 0x504   :  { %v1521_v56 = vmul.f32 -1.442695, %v930_v53  ;;  %v1522_v61 = vmul.f32 -1.442695, %v932_v59 }
 0x505   :  { %2121 = vpow2.f32 %v1520_v54 }
 0x506   :  { %2123 = vpow2.f32 %v1521_v56  ;;  %v1525_v56 = vld [vmem:[%s2855_s0 + $0xb0] sm:$0xff] }
 0x507   :  { %2125 = vpow2.f32 %v1522_v61 }
 0x508   :  { %2127 = vtanh.f32 %v931_v63 }
 0x50f   :  { %v2122_v1 = vpop.eup %2121 }
 0x510   :  { %v2124_v2 = vpop.eup %2123  ;;  %v936_v5 = vadd.f32 1.0, %v2122_v1 }
 0x511   :  { %v942_v6 = vadd.f32 1.0, %v2124_v2  ;;  %v2126_v11 = vpop.eup %2125 }
 0x512   :  { %2129 = vrcp.f32 %v936_v5  ;;  %v2128_v12 = vpop.eup %2127  ;;  %v949_v20 = vadd.f32 1.0, %v2126_v11 }
 0x513   :  { %2131 = vrcp.f32 %v942_v6 }
 0x514   :  { %2133 = vrcp.f32 %v949_v20 }
 0x51c   :  { %v2130_v13 = vpop.eup %2129 }
 0x51d   :  { %v2132_v16 = vpop.eup %2131  ;;  %v953_v19 = vmul.f32 %v2130_v13, %v2128_v12 }
 0x51e   :  { %v952_v21 = vmul.f32 %v2132_v16, %v2691_v28  ;;  %v2134_v36 = vpop.eup %2133  ;;  %v1523_v28 = vld [vmem:[%s2855_s0 + $0xa0] sm:$0xff] }
 0x520   :  { %v2741_v23 = vadd.f32 %v953_v19, %v952_v21 }
 0x522   :  { %2135 = vtanh.f32 %v2741_v23 }
 0x52c   :  { %v2136_v38 = vpop.eup %2135 }
 0x52d   :  { %v956_v43 = vmul.f32 %v2136_v38, %v2134_v36 }
 0x52f   :  { %1027 = vmatmul.mubr.f32.vlgmr.msra.gmra.mrb[10].mxu0 %v956_v43  ;;  %1098 = vmatmul.mubr.f32.vlgmr.msra.gmra.mrb[10].mxu1 %v956_v43 }
 0x530   :  { %1931 = vmatpush1.bf16.msra.mxu0 %v2223_v8  ;;  %1963 = vmatpush1.bf16.msra.mxu1 %v2272_v25 }
 0x531   :  { %1933 = vmatprep.subr.bf16.mxu0 %v2225_v9  ;;  %1965 = vmatprep.subr.bf16.mxu1 %v2297_v33 }
 0x532   :  { %1201 = vmatprep.mubr.f32.mxu0 %v2185_v3  ;;  %1272 = vmatprep.mubr.f32.mxu1 %v2185_v3 }
 0x534   :  { %1935 = vmatpush1.bf16.msra.mxu0 %v2241_v14  ;;  %1967 = vmatpush1.bf16.msra.mxu1 %v2308_v37 }
 0x535   :  { %1937 = vmatprep.subr.bf16.mxu0 %v2250_v17  ;;  %1969 = vmatprep.subr.bf16.mxu1 %v2332_v45 }
 0x538   :  { %1939 = vmatpush1.bf16.msra.mxu0 %v2275_v26  ;;  %1971 = vmatpush1.bf16.msra.mxu1 %v2341_v48 }
 0x539   :  { %1941 = vmatprep.subr.bf16.mxu0 %v2288_v30  ;;  %1973 = vmatprep.subr.bf16.mxu1 %v2353_v52 }
 0x53c   :  { %1943 = vmatpush1.bf16.msra.mxu0 %v2324_v42  ;;  %1975 = vmatpush1.bf16.msra.mxu1 %v2383_v62 }
 0x53d   :  { %1945 = vmatprep.subr.bf16.mxu0 %v2335_v46  ;;  %1977 = vmatprep.subr.bf16.mxu1 %v2389_v0 }
 0x540   :  { %1947 = vmatpush1.bf16.msra.mxu0 %v2362_v55  ;;  %1979 = vmatpush1.bf16.msra.mxu1 %v2419_v15 }
 0x541   :  { %1949 = vmatprep.subr.bf16.mxu0 %v2371_v58  ;;  %1981 = vmatprep.subr.bf16.mxu1 %v2425_v18 }
 0x544   :  { %1951 = vmatpush1.bf16.msra.mxu0 %v2404_v7  ;;  %1983 = vmatpush1.bf16.msra.mxu1 %v2452_v31 }
 0x545   :  { %1953 = vmatprep.subr.bf16.mxu0 %v2407_v10  ;;  %1985 = vmatprep.subr.bf16.mxu1 %v2455_v32 }
 0x548   :  { %1955 = vmatpush1.bf16.msra.mxu0 %v2440_v24  ;;  %1987 = vmatpush1.bf16.msra.mxu1 %v2474_v40 }
 0x549   :  { %1957 = vmatprep.subr.bf16.mxu0 %v2443_v27  ;;  %1989 = vmatprep.subr.bf16.mxu1 %v2477_v41 }
 0x54c   :  { %1959 = vmatpush1.bf16.msra.mxu0 %v2470_v39  ;;  %1991 = vmatpush1.bf16.msra.mxu1 %v2487_v47 }
 0x54d   :  { %1993 = vmatprep.subr.bf16.mxu0 %v2212_v4  ;;  %2025 = vmatprep.subr.bf16.mxu1 %v2264_v22  ;;  %v1526_v4 = vld [vmem:[%s2855_s0 + $0xb8] sm:$0xff] }
 0x602   :  { %v1028_v34 = vpop.f32.mrb[10].mxu0  ;;  %v1099_v35 = vpop.f32.mrb[10].mxu1 }
 0x603   :  { %v1104_v44 = vadd.f32 %v1523_v28, %v1028_v34  ;;  %v1030_v49 = vpop.f32.mrb[11].mxu0  ;;  %v1101_v50 = vpop.f32.mrb[11].mxu1  ;;  %v1106_v59 = vadd.f32 %v1525_v56, %v1099_v35 }
 0x604   :  { %v1105_v51 = vadd.f32 %v1524_v29, %v1030_v49  ;;  %v1107_v22 = vadd.f32 %v1526_v4, %v1101_v50  ;;  %v1540_v50 = vld [vmem:[%s2855_s0 + $0xf8] sm:$0xff] }
 0x605   :  { %v1527_v53 = vmul.f32 -1.442695, %v1104_v44 }
 0x606   :  { %v1528_v54 = vmul.f32 -1.442695, %v1105_v51  ;;  %v1529_v57 = vmul.f32 -1.442695, %v1107_v22 }
 0x607   :  { %2137 = vpow2.f32 %v1527_v53  ;;  %v1539_v53 = vld [vmem:[%s2855_s0 + $0xf0] sm:$0xff] }
 0x608   :  { %2139 = vpow2.f32 %v1528_v54 }
 0x609   :  { %2141 = vpow2.f32 %v1529_v57 }
 0x60a   :  { %2143 = vtanh.f32 %v1106_v59 }
 0x611   :  { %v2138_v60 = vpop.eup %2137 }
 0x612   :  { %v2140_v61 = vpop.eup %2139  ;;  %v1111_v63 = vadd.f32 1.0, %v2138_v60 }
 0x613   :  { %v1117_v1 = vadd.f32 1.0, %v2140_v61  ;;  %v2142_v2 = vpop.eup %2141 }
 0x614   :  { %2145 = vrcp.f32 %v1111_v63  ;;  %v2144_v5 = vpop.eup %2143  ;;  %v1124_v13 = vadd.f32 1.0, %v2142_v2 }
 0x615   :  { %2147 = vrcp.f32 %v1117_v1 }
 0x616   :  { %2149 = vrcp.f32 %v1124_v13 }
 0x61e   :  { %v2146_v6 = vpop.eup %2145 }
 0x61f   :  { %v2148_v11 = vpop.eup %2147  ;;  %v1128_v12 = vmul.f32 %v2146_v6, %v2144_v5 }
 0x620   :  { %v1127_v16 = vmul.f32 %v2148_v11, %v2741_v23  ;;  %v2150_v20 = vpop.eup %2149  ;;  %v1538_v23 = vld [vmem:[%s2855_s0 + $0xe8] sm:$0xff] }
 0x622   :  { %v2791_v19 = vadd.f32 %v1128_v12, %v1127_v16 }
 0x624   :  { %2151 = vtanh.f32 %v2791_v19 }
 0x62e   :  { %v2152_v21 = vpop.eup %2151 }
 0x62f   :  { %v1131_v36 = vmul.f32 %v2152_v21, %v2150_v20 }
 0x631   :  { %1202 = vmatmul.mubr.f32.vlgmr.msra.gmra.mrb[12].mxu0 %v1131_v36  ;;  %1273 = vmatmul.mubr.f32.vlgmr.msra.gmra.mrb[12].mxu1 %v1131_v36 }
 0x632   :  { %1995 = vmatpush1.bf16.msra.mxu0 %v2223_v8  ;;  %2027 = vmatpush1.bf16.msra.mxu1 %v2272_v25  ;;  %v1531_v8 = vld [vmem:[%s2855_s0 + $0xc8] sm:$0xff] }
 0x633   :  { %1997 = vmatprep.subr.bf16.mxu0 %v2225_v9  ;;  %2029 = vmatprep.subr.bf16.mxu1 %v2297_v33 }
 0x634   :  { %1376 = vmatprep.mubr.f32.mxu0 %v2185_v3  ;;  %1447 = vmatprep.mubr.f32.mxu1 %v2185_v3  ;;  %v1530_v3 = vld [vmem:[%s2855_s0 + $0xc0] sm:$0xff] }
 0x636   :  { %1999 = vmatpush1.bf16.msra.mxu0 %v2241_v14  ;;  %2031 = vmatpush1.bf16.msra.mxu1 %v2308_v37 }
 0x637   :  { %2001 = vmatprep.subr.bf16.mxu0 %v2250_v17  ;;  %2033 = vmatprep.subr.bf16.mxu1 %v2332_v45 }
 0x63a   :  { %2003 = vmatpush1.bf16.msra.mxu0 %v2275_v26  ;;  %2035 = vmatpush1.bf16.msra.mxu1 %v2341_v48 }
 0x63b   :  { %2005 = vmatprep.subr.bf16.mxu0 %v2288_v30  ;;  %2037 = vmatprep.subr.bf16.mxu1 %v2353_v52 }
 0x63e   :  { %2007 = vmatpush1.bf16.msra.mxu0 %v2324_v42  ;;  %2039 = vmatpush1.bf16.msra.mxu1 %v2383_v62  ;;  %v1533_v42 = vld [vmem:[%s2855_s0 + $0xd8] sm:$0xff] }
 0x63f   :  { %2009 = vmatprep.subr.bf16.mxu0 %v2335_v46  ;;  %2041 = vmatprep.subr.bf16.mxu1 %v2389_v0  ;;  %v1532_v46 = vld [vmem:[%s2855_s0 + $0xd0] sm:$0xff] }
 0x642   :  { %2011 = vmatpush1.bf16.msra.mxu0 %v2362_v55  ;;  %2043 = vmatpush1.bf16.msra.mxu1 %v2419_v15 }
 0x643   :  { %2013 = vmatprep.subr.bf16.mxu0 %v2371_v58  ;;  %2045 = vmatprep.subr.bf16.mxu1 %v2425_v18 }
 0x646   :  { %2015 = vmatpush1.bf16.msra.mxu0 %v2404_v7  ;;  %2047 = vmatpush1.bf16.msra.mxu1 %v2452_v31 }
 0x647   :  { %2017 = vmatprep.subr.bf16.mxu0 %v2407_v10  ;;  %2049 = vmatprep.subr.bf16.mxu1 %v2455_v32 }
 0x64a   :  { %2019 = vmatpush1.bf16.msra.mxu0 %v2440_v24  ;;  %2051 = vmatpush1.bf16.msra.mxu1 %v2474_v40 }
 0x64b   :  { %2021 = vmatprep.subr.bf16.mxu0 %v2443_v27  ;;  %2053 = vmatprep.subr.bf16.mxu1 %v2477_v41 }
 0x64e   :  { %2023 = vmatpush1.bf16.msra.mxu0 %v2470_v39  ;;  %2055 = vmatpush1.bf16.msra.mxu1 %v2487_v47  ;;  %v1537_v47 = vld [vmem:[%s2855_s0 + $0xe0] sm:$0xff] }
 0x704   :  { %v1203_v9 = vpop.f32.mrb[12].mxu0  ;;  %v1274_v14 = vpop.f32.mrb[12].mxu1 }
 0x705   :  { %v1279_v17 = vadd.f32 %v1530_v3, %v1203_v9  ;;  %v1205_v25 = vpop.f32.mrb[13].mxu0  ;;  %v1276_v26 = vpop.f32.mrb[13].mxu1  ;;  %v1281_v52 = vadd.f32 %v1532_v46, %v1274_v14 }
 0x706   :  { %v1280_v30 = vadd.f32 %v1531_v8, %v1205_v25  ;;  %v1282_v45 = vadd.f32 %v1533_v42, %v1276_v26 }
 0x707   :  { %v1534_v33 = vmul.f32 -1.442695, %v1279_v17 }
 0x708   :  { %v1535_v37 = vmul.f32 -1.442695, %v1280_v30  ;;  %v1536_v48 = vmul.f32 -1.442695, %v1282_v45 }
 0x709   :  { %2153 = vpow2.f32 %v1534_v33 }
 0x70a   :  { %2155 = vpow2.f32 %v1535_v37 }
 0x70b   :  { %2157 = vpow2.f32 %v1536_v48 }
 0x70c   :  { %2159 = vtanh.f32 %v1281_v52 }
 0x713   :  { %v2154_v55 = vpop.eup %2153 }
 0x714   :  { %v2156_v58 = vpop.eup %2155  ;;  %v1286_v62 = vadd.f32 1.0, %v2154_v55 }
 0x715   :  { %v1292_v0 = vadd.f32 1.0, %v2156_v58  ;;  %v2158_v7 = vpop.eup %2157 }
 0x716   :  { %2161 = vrcp.f32 %v1286_v62  ;;  %v2160_v10 = vpop.eup %2159  ;;  %v1299_v27 = vadd.f32 1.0, %v2158_v7 }
 0x717   :  { %2163 = vrcp.f32 %v1292_v0 }
 0x718   :  { %2165 = vrcp.f32 %v1299_v27 }
 0x720   :  { %v2162_v15 = vpop.eup %2161 }
 0x721   :  { %v2164_v18 = vpop.eup %2163  ;;  %v1303_v24 = vmul.f32 %v2162_v15, %v2160_v10 }
 0x722   :  { %v1302_v31 = vmul.f32 %v2164_v18, %v2791_v19  ;;  %v2166_v39 = vpop.eup %2165 }
 0x724   :  { %v1304_v32 = vadd.f32 %v1303_v24, %v1302_v31 }
 0x726   :  { %2167 = vtanh.f32 %v1304_v32 }
 0x730   :  { %v2168_v40 = vpop.eup %2167 }
 0x731   :  { %v1306_v41 = vmul.f32 %v2168_v40, %v2166_v39 }
 0x733   :  { %1377 = vmatmul.mubr.f32.vlgmr.msra.gmra.mrb[14].mxu0 %v1306_v41  ;;  %1448 = vmatmul.mubr.f32.vlgmr.msra.gmra.mrb[14].mxu1 %v1306_v41 }
 0x806   :  { %v1378_v38 = vpop.f32.mrb[14].mxu0  ;;  %v1449_v43 = vpop.f32.mrb[14].mxu1 }
 0x807   :  { %v1454_v28 = vadd.f32 %v1537_v47, %v1378_v38  ;;  %v1380_v29 = vpop.f32.mrb[15].mxu0  ;;  %v1451_v34 = vpop.f32.mrb[15].mxu1  ;;  %v1456_v4 = vadd.f32 %v1539_v53, %v1449_v43 }
 0x808   :  { %v1455_v35 = vadd.f32 %v1538_v23, %v1380_v29  ;;  %v1457_v51 = vadd.f32 %v1540_v50, %v1451_v34 }
 0x809   :  { %v1541_v44 = vmul.f32 -1.442695, %v1454_v28 }
 0x80a   :  { %v1542_v49 = vmul.f32 -1.442695, %v1455_v35  ;;  %v1543_v54 = vmul.f32 -1.442695, %v1457_v51 }
 0x80b   :  { %2169 = vpow2.f32 %v1541_v44 }
 0x80c   :  { %2171 = vpow2.f32 %v1542_v49 }
 0x80d   :  { %2173 = vpow2.f32 %v1543_v54 }
 0x80e   :  { %2175 = vtanh.f32 %v1456_v4 }
 0x815   :  { %v2170_v22 = vpop.eup %2169 }
 0x816   :  { %v2172_v56 = vpop.eup %2171  ;;  %v1461_v57 = vadd.f32 1.0, %v2170_v22 }
 0x817   :  { %v1467_v59 = vadd.f32 1.0, %v2172_v56  ;;  %v2174_v60 = vpop.eup %2173 }
 0x818   :  { %2177 = vrcp.f32 %v1461_v57  ;;  %v2176_v61 = vpop.eup %2175  ;;  %v1474_v5 = vadd.f32 1.0, %v2174_v60 }
 0x819   :  { %2179 = vrcp.f32 %v1467_v59 }
 0x81a   :  { %2181 = vrcp.f32 %v1474_v5 }
 0x822   :  { %v2178_v63 = vpop.eup %2177 }
 0x823   :  { %v2180_v1 = vpop.eup %2179  ;;  %v1478_v2 = vmul.f32 %v2178_v63, %v2176_v61 }
 0x824   :  { %v1477_v6 = vmul.f32 %v2180_v1, %v1304_v32  ;;  %v2182_v12 = vpop.eup %2181 }
 0x826   :  { %v1479_v11 = vadd.f32 %v1478_v2, %v1477_v6 }
 0x828   :  { %2183 = vtanh.f32 %v1479_v11 }
 0x832   :  { %v2184_v13 = vpop.eup %2183 }
 0x833   :  { %v1481_v16 = vmul.f32 %v2184_v13, %v2182_v12 }
 0x835   :  { %1487 = vst [vmem:[%s2856_s2] sm:$0xff] %v1481_v16 }

</bundles_post_ra>
